<compile_context>
chip_gen: v5e
topology: v5e:2x2
jax: 0.10.0
libtpu: 0.0.40
codegen_flags: <defaults>
</compile_context>

<pallas_src>
import functools

import jax
import jax.numpy as jnp
from jax.experimental import pallas as pl
from jax.experimental.pallas import tpu as pltpu

LEAKY_SLOPE = 0.01          # PyTorch nn.LeakyReLU default negative_slope
N_LAYERS = 8
_NO_ACT = (3, 7)            # no activation after encoder[-1] and decoder[-1]
LANE = 128


def _round_up(n, m):
    return ((n + m - 1) // m) * m


# --------------------------------- kernel ------------------------------------

def _autoencoder_kernel(x_ref, w0_ref, wr_ref, b_ref, o_ref, *, n_layers, no_act):
    """x_ref: (TB, D); w0_ref: (D, Dp); wr_ref: (L-1, Dp, Dp); b_ref: (L, Dp); o_ref: (TB, Dp).

    MXU matmuls always accumulate in f32; the bias/LeakyReLU epilogue runs in
    b_ref.dtype (f32 on v5e/f32-path, bf16 on v6e/v7x).
    """
    h = x_ref[...]
    for i in range(n_layers):
        if i == 0:
            acc = jnp.dot(h.astype(w0_ref.dtype), w0_ref[...],
                          preferred_element_type=jnp.float32)
        else:
            acc = jnp.dot(h.astype(wr_ref.dtype), wr_ref[i - 1],
                          preferred_element_type=jnp.float32)
        # (1, Dp) bias row broadcasts over the batch sublanes.
        acc = acc.astype(b_ref.dtype) + b_ref[i:i + 1, :]
        if i not in no_act:
            acc = jnp.maximum(acc, LEAKY_SLOPE * acc)   # LeakyReLU (slope < 1)
        h = acc
    o_ref[...] = h.astype(o_ref.dtype)


# --------------------------------- wrapper -----------------------------------

@functools.partial(jax.jit, static_argnames=("batch_tile",))
def autoencoder_forward(x, w0, w_rest, b_pack, *, batch_tile=1024):
    """x: (B, vector_dim) f32; w0: (D, Dp); w_rest: (L-1, Dp, Dp); b_pack: (L, Dp).

    Returns (B, vector_dim) in the weight compute dtype (bf16 or f32).
    """
    B, D = x.shape
    Dp = w0.shape[1]
    L = b_pack.shape[0]
    compute_dtype = w0.dtype
    out_dtype = compute_dtype            # bf16 out halves store traffic when mem-bound

    # Sublane-aligned batch tile, >= 2 grid steps when possible (v7x megacore).
    B8 = _round_up(B, 8)
    tb = max(8, min(_round_up(int(batch_tile), 8), B8))
    if B8 >= 16:
        tb = min(tb, max(8, _round_up((B8 + 1) // 2, 8)))
    Bp = _round_up(B, tb)

    # Pad batch only when ragged (no lane padding, no dtype cast pass over x).
    xp = x if Bp == B else jnp.zeros((Bp, D), x.dtype).at[:B, :].set(x)

    w_item = jnp.dtype(compute_dtype).itemsize
    flops = 2 * Bp * (D * Dp + (L - 1) * Dp * Dp)
    bytes_accessed = (Bp * D * x.dtype.itemsize                       # x
                      + D * Dp * w_item + (L - 1) * Dp * Dp * w_item  # weights
                      + L * Dp * jnp.dtype(b_pack.dtype).itemsize     # biases
                      + Bp * Dp * jnp.dtype(out_dtype).itemsize)      # output

    kernel = functools.partial(_autoencoder_kernel, n_layers=L, no_act=_NO_ACT)

    out = pl.pallas_call(
        kernel,
        out_shape=jax.ShapeDtypeStruct((Bp, Dp), out_dtype),
        grid=(Bp // tb,),
        in_specs=[
            pl.BlockSpec((tb, D), lambda i: (i, 0)),             # x: pipelined over batch
            pl.BlockSpec((D, Dp), lambda i: (0, 0)),             # layer-0 weight: resident
            pl.BlockSpec((L - 1, Dp, Dp), lambda i: (0, 0, 0)),  # packed weights: resident
            pl.BlockSpec((L, Dp), lambda i: (0, 0)),             # packed biases: resident
        ],
        out_specs=pl.BlockSpec((tb, Dp), lambda i: (i, 0)),      # lane-dense store
        compiler_params=pltpu.CompilerParams(
            dimension_semantics=("parallel",),
            vmem_limit_bytes=32 * 1024 * 1024,
        ),
        cost_estimate=pl.CostEstimate(
            flops=flops, transcendentals=0, bytes_accessed=bytes_accessed),
    )(xp, w0, w_rest, b_pack)

    return out[:B, :D]


# ----------------------------- parameter helpers -----------------------------

def layer_dims(vector_dim: int):
    compressed_dim = vector_dim // 3
    cu = (vector_dim - compressed_dim) // 4
    enc = [vector_dim, vector_dim - cu, vector_dim - 2 * cu, vector_dim - 3 * cu,
           compressed_dim]
    dec = [compressed_dim, vector_dim - 3 * cu, vector_dim - 2 * cu, vector_dim - cu,
           vector_dim]
    return list(zip(enc[:-1], enc[1:])) + list(zip(dec[:-1], dec[1:]))


def init_params(key, vector_dim: int):
    """PyTorch nn.Linear-style init: U(-1/sqrt(fan_in), 1/sqrt(fan_in)). W stored [in, out]."""
    weights, biases = [], []
    for fan_in, fan_out in layer_dims(vector_dim):
        key, kw, kb = jax.random.split(key, 3)
        bound = 1.0 / jnp.sqrt(jnp.float32(fan_in))
        weights.append(jax.random.uniform(kw, (fan_in, fan_out), jnp.float32, -bound, bound))
        biases.append(jax.random.uniform(kb, (fan_out,), jnp.float32, -bound, bound))
    return weights, biases


def default_epilogue_dtype(compute_dtype):
    """bf16 epilogue on bf16-VPU chips (v6e/v7x); f32 elsewhere (v5e and older)."""
    if jnp.dtype(compute_dtype) == jnp.dtype(jnp.float32):
        return jnp.float32
    try:
        kind = jax.devices()[0].device_kind.lower()
    except Exception:
        return jnp.float32
    if any(g in kind for g in ("v2", "v3", "v4", "v5")):
        return jnp.float32
    return compute_dtype


def pack_params(weights, biases, vector_dim: int,
                compute_dtype=jnp.bfloat16, epilogue_dtype=None):
    """Layer 0 kept at (D, Dp); layers 1..L-1 zero-padded to (Dp, Dp) and stacked."""
    if epilogue_dtype is None:
        epilogue_dtype = default_epilogue_dtype(compute_dtype)
    D = vector_dim
    Dp = _round_up(vector_dim, LANE)
    L = len(weights)

    fo0 = weights[0].shape[1]
    w0 = jnp.zeros((D, Dp), compute_dtype).at[:, :fo0].set(weights[0].astype(compute_dtype))
    w_rest = jnp.zeros((L - 1, Dp, Dp), compute_dtype)
    b_pack = jnp.zeros((L, Dp), epilogue_dtype)
    b_pack = b_pack.at[0, :fo0].set(biases[0].astype(epilogue_dtype))
    for i in range(1, L):
        fi, fo = weights[i].shape
        w_rest = w_rest.at[i - 1, :fi, :fo].set(weights[i].astype(compute_dtype))
        b_pack = b_pack.at[i, :fo].set(biases[i].astype(epilogue_dtype))
    return w0, w_rest, b_pack


def reference_forward(x, weights, biases):
    """Pure-JAX reference matching the PyTorch module semantics."""
    h = x
    for i, (w, b) in enumerate(zip(weights, biases)):
        h = h @ w + b
        if i not in _NO_ACT:
            h = jnp.where(h > 0, h, LEAKY_SLOPE * h)
    return h


if __name__ == "__main__":
    VECTOR_DIM = 96      # divisible by 3 -> compressed_dim=32, compress_unit=16
    BATCH = 512

    key = jax.random.PRNGKey(0)
    key, kx = jax.random.split(key)
    x = jax.random.normal(kx, (BATCH, VECTOR_DIM), jnp.float32)
    weights, biases = init_params(key, VECTOR_DIM)

    ref = reference_forward(x, weights, biases)

    # f32 path (tight correctness check)
    w0_32, wr_32, b_32 = pack_params(weights, biases, VECTOR_DIM,
                                     compute_dtype=jnp.float32)
    out32 = jax.block_until_ready(autoencoder_forward(x, w0_32, wr_32, b_32))
    assert out32.shape == (BATCH, VECTOR_DIM)
    assert jnp.allclose(out32, ref, atol=1e-5, rtol=1e-5), "f32 Pallas kernel mismatch"

    # bf16 default path (bf16 weights/activations/output, f32 MXU accumulation;
    # epilogue dtype chosen per chip generation)
    w0_bf, wr_bf, b_bf = pack_params(weights, biases, VECTOR_DIM,
                                     compute_dtype=jnp.bfloat16)
    outbf = jax.block_until_ready(autoencoder_forward(x, w0_bf, wr_bf, b_bf))
    assert outbf.shape == (BATCH, VECTOR_DIM)
    err = float(jnp.max(jnp.abs(outbf.astype(jnp.float32) - ref)))
    assert err < 0.15, f"bf16 Pallas kernel drifted too far (max abs err {err})"

    print("KERNEL_OK")
</pallas_src>

<mosaic_0001>
module attributes {stable_mosaic.version = 11 : i64} {
  func.func @_autoencoder_kernel(%arg0: i32, %arg1: memref<256x96xf32, #tpu.memory_space<vmem>>, %arg2: memref<96x128xf32, #tpu.memory_space<vmem>>, %arg3: memref<7x128x128xf32, #tpu.memory_space<vmem>>, %arg4: memref<8x128xf32, #tpu.memory_space<vmem>>, %arg5: memref<256x128xf32, #tpu.memory_space<vmem>>) attributes {dimension_semantics = [#tpu.dimension_semantics<parallel>], iteration_bounds = array<i64: 2>, scalar_prefetch = 0 : i64, scratch_operands = 0 : i64, tpu.core_type = #tpu.core_type<tc>, window_params = [{transform_indices = @transform_0, window_bounds = array<i64: 256, 96>}, {pipeline_mode = #tpu.pipeline_mode<synchronous>, transform_indices = @transform_1, window_bounds = array<i64: 96, 128>}, {pipeline_mode = #tpu.pipeline_mode<synchronous>, transform_indices = @transform_2, window_bounds = array<i64: 7, 128, 128>}, {pipeline_mode = #tpu.pipeline_mode<synchronous>, transform_indices = @transform_3, window_bounds = array<i64: 8, 128>}, {transform_indices = @transform_4, window_bounds = array<i64: 256, 128>}]} {
    %c0 = arith.constant 0 : index
    %c0_0 = arith.constant 0 : index
    %0 = vector.load %arg1[%c0, %c0_0] : memref<256x96xf32, #tpu.memory_space<vmem>>, vector<256x96xf32>
    %c0_1 = arith.constant 0 : index
    %c0_2 = arith.constant 0 : index
    %1 = vector.load %arg2[%c0_1, %c0_2] : memref<96x128xf32, #tpu.memory_space<vmem>>, vector<96x128xf32>
    %cst = arith.constant dense<0.000000e+00> : vector<256x128xf32>
    %2 = tpu.matmul %0, %1, %cst {dimension_numbers = #tpu.dot_dimension_numbers<[1], [0], [0], [1], [0, 0, 1, 1], [], []>} : vector<256x96xf32>, vector<96x128xf32>, vector<256x128xf32> -> vector<256x128xf32>
    %c0_3 = arith.constant 0 : index
    %c0_4 = arith.constant 0 : index
    %3 = vector.load %arg4[%c0_3, %c0_4] : memref<8x128xf32, #tpu.memory_space<vmem>>, vector<1x128xf32>
    %4 = vector.broadcast %3 : vector<1x128xf32> to vector<256x128xf32>
    %5 = arith.addf %2, %4 : vector<256x128xf32>
    %cst_5 = arith.constant 0.00999999977 : f32
    %6 = vector.broadcast %cst_5 : f32 to vector<256x128xf32>
    %7 = arith.mulf %6, %5 : vector<256x128xf32>
    %8 = arith.maximumf %5, %7 : vector<256x128xf32>
    %c0_6 = arith.constant 0 : index
    %c0_7 = arith.constant 0 : index
    %c0_8 = arith.constant 0 : index
    %9 = vector.load %arg3[%c0_6, %c0_7, %c0_8] : memref<7x128x128xf32, #tpu.memory_space<vmem>>, vector<1x128x128xf32>
    %10 = vector.shape_cast %9 : vector<1x128x128xf32> to vector<128x128xf32>
    %cst_9 = arith.constant dense<0.000000e+00> : vector<256x128xf32>
    %11 = tpu.matmul %8, %10, %cst_9 {dimension_numbers = #tpu.dot_dimension_numbers<[1], [0], [0], [1], [0, 0, 1, 1], [], []>} : vector<256x128xf32>, vector<128x128xf32>, vector<256x128xf32> -> vector<256x128xf32>
    %c1 = arith.constant 1 : index
    %c0_10 = arith.constant 0 : index
    %12 = vector.load %arg4[%c1, %c0_10] : memref<8x128xf32, #tpu.memory_space<vmem>>, vector<1x128xf32>
    %13 = vector.broadcast %12 : vector<1x128xf32> to vector<256x128xf32>
    %14 = arith.addf %11, %13 : vector<256x128xf32>
    %cst_11 = arith.constant 0.00999999977 : f32
    %15 = vector.broadcast %cst_11 : f32 to vector<256x128xf32>
    %16 = arith.mulf %15, %14 : vector<256x128xf32>
    %17 = arith.maximumf %14, %16 : vector<256x128xf32>
    %c1_12 = arith.constant 1 : index
    %c0_13 = arith.constant 0 : index
    %c0_14 = arith.constant 0 : index
    %18 = vector.load %arg3[%c1_12, %c0_13, %c0_14] : memref<7x128x128xf32, #tpu.memory_space<vmem>>, vector<1x128x128xf32>
    %19 = vector.shape_cast %18 : vector<1x128x128xf32> to vector<128x128xf32>
    %cst_15 = arith.constant dense<0.000000e+00> : vector<256x128xf32>
    %20 = tpu.matmul %17, %19, %cst_15 {dimension_numbers = #tpu.dot_dimension_numbers<[1], [0], [0], [1], [0, 0, 1, 1], [], []>} : vector<256x128xf32>, vector<128x128xf32>, vector<256x128xf32> -> vector<256x128xf32>
    %c2 = arith.constant 2 : index
    %c0_16 = arith.constant 0 : index
    %21 = vector.load %arg4[%c2, %c0_16] : memref<8x128xf32, #tpu.memory_space<vmem>>, vector<1x128xf32>
    %22 = vector.broadcast %21 : vector<1x128xf32> to vector<256x128xf32>
    %23 = arith.addf %20, %22 : vector<256x128xf32>
    %cst_17 = arith.constant 0.00999999977 : f32
    %24 = vector.broadcast %cst_17 : f32 to vector<256x128xf32>
    %25 = arith.mulf %24, %23 : vector<256x128xf32>
    %26 = arith.maximumf %23, %25 : vector<256x128xf32>
    %c2_18 = arith.constant 2 : index
    %c0_19 = arith.constant 0 : index
    %c0_20 = arith.constant 0 : index
    %27 = vector.load %arg3[%c2_18, %c0_19, %c0_20] : memref<7x128x128xf32, #tpu.memory_space<vmem>>, vector<1x128x128xf32>
    %28 = vector.shape_cast %27 : vector<1x128x128xf32> to vector<128x128xf32>
    %cst_21 = arith.constant dense<0.000000e+00> : vector<256x128xf32>
    %29 = tpu.matmul %26, %28, %cst_21 {dimension_numbers = #tpu.dot_dimension_numbers<[1], [0], [0], [1], [0, 0, 1, 1], [], []>} : vector<256x128xf32>, vector<128x128xf32>, vector<256x128xf32> -> vector<256x128xf32>
    %c3 = arith.constant 3 : index
    %c0_22 = arith.constant 0 : index
    %30 = vector.load %arg4[%c3, %c0_22] : memref<8x128xf32, #tpu.memory_space<vmem>>, vector<1x128xf32>
    %31 = vector.broadcast %30 : vector<1x128xf32> to vector<256x128xf32>
    %32 = arith.addf %29, %31 : vector<256x128xf32>
    %c3_23 = arith.constant 3 : index
    %c0_24 = arith.constant 0 : index
    %c0_25 = arith.constant 0 : index
    %33 = vector.load %arg3[%c3_23, %c0_24, %c0_25] : memref<7x128x128xf32, #tpu.memory_space<vmem>>, vector<1x128x128xf32>
    %34 = vector.shape_cast %33 : vector<1x128x128xf32> to vector<128x128xf32>
    %cst_26 = arith.constant dense<0.000000e+00> : vector<256x128xf32>
    %35 = tpu.matmul %32, %34, %cst_26 {dimension_numbers = #tpu.dot_dimension_numbers<[1], [0], [0], [1], [0, 0, 1, 1], [], []>} : vector<256x128xf32>, vector<128x128xf32>, vector<256x128xf32> -> vector<256x128xf32>
    %c4 = arith.constant 4 : index
    %c0_27 = arith.constant 0 : index
    %36 = vector.load %arg4[%c4, %c0_27] : memref<8x128xf32, #tpu.memory_space<vmem>>, vector<1x128xf32>
    %37 = vector.broadcast %36 : vector<1x128xf32> to vector<256x128xf32>
    %38 = arith.addf %35, %37 : vector<256x128xf32>
    %cst_28 = arith.constant 0.00999999977 : f32
    %39 = vector.broadcast %cst_28 : f32 to vector<256x128xf32>
    %40 = arith.mulf %39, %38 : vector<256x128xf32>
    %41 = arith.maximumf %38, %40 : vector<256x128xf32>
    %c4_29 = arith.constant 4 : index
    %c0_30 = arith.constant 0 : index
    %c0_31 = arith.constant 0 : index
    %42 = vector.load %arg3[%c4_29, %c0_30, %c0_31] : memref<7x128x128xf32, #tpu.memory_space<vmem>>, vector<1x128x128xf32>
    %43 = vector.shape_cast %42 : vector<1x128x128xf32> to vector<128x128xf32>
    %cst_32 = arith.constant dense<0.000000e+00> : vector<256x128xf32>
    %44 = tpu.matmul %41, %43, %cst_32 {dimension_numbers = #tpu.dot_dimension_numbers<[1], [0], [0], [1], [0, 0, 1, 1], [], []>} : vector<256x128xf32>, vector<128x128xf32>, vector<256x128xf32> -> vector<256x128xf32>
    %c5 = arith.constant 5 : index
    %c0_33 = arith.constant 0 : index
    %45 = vector.load %arg4[%c5, %c0_33] : memref<8x128xf32, #tpu.memory_space<vmem>>, vector<1x128xf32>
    %46 = vector.broadcast %45 : vector<1x128xf32> to vector<256x128xf32>
    %47 = arith.addf %44, %46 : vector<256x128xf32>
    %cst_34 = arith.constant 0.00999999977 : f32
    %48 = vector.broadcast %cst_34 : f32 to vector<256x128xf32>
    %49 = arith.mulf %48, %47 : vector<256x128xf32>
    %50 = arith.maximumf %47, %49 : vector<256x128xf32>
    %c5_35 = arith.constant 5 : index
    %c0_36 = arith.constant 0 : index
    %c0_37 = arith.constant 0 : index
    %51 = vector.load %arg3[%c5_35, %c0_36, %c0_37] : memref<7x128x128xf32, #tpu.memory_space<vmem>>, vector<1x128x128xf32>
    %52 = vector.shape_cast %51 : vector<1x128x128xf32> to vector<128x128xf32>
    %cst_38 = arith.constant dense<0.000000e+00> : vector<256x128xf32>
    %53 = tpu.matmul %50, %52, %cst_38 {dimension_numbers = #tpu.dot_dimension_numbers<[1], [0], [0], [1], [0, 0, 1, 1], [], []>} : vector<256x128xf32>, vector<128x128xf32>, vector<256x128xf32> -> vector<256x128xf32>
    %c6 = arith.constant 6 : index
    %c0_39 = arith.constant 0 : index
    %54 = vector.load %arg4[%c6, %c0_39] : memref<8x128xf32, #tpu.memory_space<vmem>>, vector<1x128xf32>
    %55 = vector.broadcast %54 : vector<1x128xf32> to vector<256x128xf32>
    %56 = arith.addf %53, %55 : vector<256x128xf32>
    %cst_40 = arith.constant 0.00999999977 : f32
    %57 = vector.broadcast %cst_40 : f32 to vector<256x128xf32>
    %58 = arith.mulf %57, %56 : vector<256x128xf32>
    %59 = arith.maximumf %56, %58 : vector<256x128xf32>
    %c6_41 = arith.constant 6 : index
    %c0_42 = arith.constant 0 : index
    %c0_43 = arith.constant 0 : index
    %60 = vector.load %arg3[%c6_41, %c0_42, %c0_43] : memref<7x128x128xf32, #tpu.memory_space<vmem>>, vector<1x128x128xf32>
    %61 = vector.shape_cast %60 : vector<1x128x128xf32> to vector<128x128xf32>
    %cst_44 = arith.constant dense<0.000000e+00> : vector<256x128xf32>
    %62 = tpu.matmul %59, %61, %cst_44 {dimension_numbers = #tpu.dot_dimension_numbers<[1], [0], [0], [1], [0, 0, 1, 1], [], []>} : vector<256x128xf32>, vector<128x128xf32>, vector<256x128xf32> -> vector<256x128xf32>
    %c7 = arith.constant 7 : index
    %c0_45 = arith.constant 0 : index
    %63 = vector.load %arg4[%c7, %c0_45] : memref<8x128xf32, #tpu.memory_space<vmem>>, vector<1x128xf32>
    %64 = vector.broadcast %63 : vector<1x128xf32> to vector<256x128xf32>
    %65 = arith.addf %62, %64 : vector<256x128xf32>
    %c0_46 = arith.constant 0 : index
    %c0_47 = arith.constant 0 : index
    %66 = vector.load %arg5[%c0_46, %c0_47] : memref<256x128xf32, #tpu.memory_space<vmem>>, vector<256x128xf32>
    tpu.vector_store %arg5[%c0_46, %c0_47], %65 {strides = array<i32>} : memref<256x128xf32, #tpu.memory_space<vmem>>, vector<256x128xf32>,
    return
  }
  func.func @transform_0(%arg0: i32) -> (i32, i32) {
    %c0_i32 = arith.constant 0 : i32
    %c0_i32_0 = arith.constant 0 : i32
    return %arg0, %c0_i32 : i32, i32
  }
  func.func @transform_1(%arg0: i32) -> (i32, i32) {
    %c0_i32 = arith.constant 0 : i32
    %c0_i32_0 = arith.constant 0 : i32
    %c0_i32_1 = arith.constant 0 : i32
    return %c0_i32, %c0_i32_0 : i32, i32
  }
  func.func @transform_2(%arg0: i32) -> (i32, i32, i32) {
    %c0_i32 = arith.constant 0 : i32
    %c0_i32_0 = arith.constant 0 : i32
    %c0_i32_1 = arith.constant 0 : i32
    %c0_i32_2 = arith.constant 0 : i32
    return %c0_i32, %c0_i32_0, %c0_i32_1 : i32, i32, i32
  }
  func.func @transform_3(%arg0: i32) -> (i32, i32) {
    %c0_i32 = arith.constant 0 : i32
    %c0_i32_0 = arith.constant 0 : i32
    %c0_i32_1 = arith.constant 0 : i32
    return %c0_i32, %c0_i32_0 : i32, i32
  }
  func.func @transform_4(%arg0: i32) -> (i32, i32) {
    %c0_i32 = arith.constant 0 : i32
    %c0_i32_0 = arith.constant 0 : i32
    return %arg0, %c0_i32 : i32, i32
  }
}

</mosaic_0001>

<bundles_post_ra>
// kernel: autoencoder_forward.1
= control target key start
LH: loop header
LB: loop body
LE: loop exit
PB: predicated region body
PF: predicated region fallthrough
CT: control target
= control target key end

     0   :  { %9 = vsyncpa [#allocation3], 0  ;;  %s2957_s0 = inlined_call_operand.vmem [shape: f32[512,96], index: 0, kind: input, shape index: {}]   ;;  %s2958_s1 = inlined_call_operand.hbm [shape: f32[96,128], index: 1, kind: input, shape index: {}]   ;;  %s2959_s2 = inlined_call_operand.vmem [shape: f32[7,128,128], index: 2, kind: input, shape index: {}]   ;;  %s2960_s3 = inlined_call_operand.hbm [shape: f32[8,128], index: 3, kind: input, shape index: {}]   ;;  %s2961_s4 = inlined_call_operand.vmem [shape: f32[512,128], index: 4, kind: output, shape index: {}]  }
   0x1   :  { %10 = vsyncpa [#allocation5], 0  ;;  %s2193_s15 = smov 0  }
   0x2 LB: > { %s147_s18 = sshll.u32 %s2958_s1, 4  ;;  %s1906_s19 = sadd.s32 4294967295, %s2162_s15   ;;  %s2162_s15 = sphi %s2193_s15, %s16_s15   ;;  %s148_s18 = int_to_ptr.hbm [resolvable:$true] %s147_s18 }
   0x3   : > { %p1908_p0 = scmp.ge.s32.totalorder %s2162_s15, 1  ;;  %p136_p1 = scmp.lt.s32.totalorder %s2162_s15, 3 }
   0x4   : > { %p2206_p2 = scmp.eq.s32.totalorder %s1906_s19, 0  ;;  %s2164_s22 = smov [#allocation2]  }
   0x5   : > { %p2210_p3 = pnand %p1908_p0, %p136_p1  ;;  %s149_s23 = sshll.u32 %s2164_s22, 4  ;;  %s150_s23 = int_to_ptr.vmem [resolvable:$true] %s149_s23 }
   0x6   : > { %s165_s26 = sshll.u32 %s2960_s3, 4  ;;  %s2165_s27 = smov [#allocation4]   ;;  %s166_s26 = int_to_ptr.hbm [resolvable:$true] %s165_s26 }
   0x7   : > { %p2057_p4 = pneg %p2210_p3  ;;  %s167_s28 = sshll.u32 %s2165_s27, 4  ;;  %s168_s28 = int_to_ptr.vmem [resolvable:$true] %s167_s28 }
   0x8   : > { %s2166_s29 = smov 128   ;;  %s2167_s30 = smov 8  }
   0x9   : > { %p2058_p5 = pnand %p2206_p2, %p2057_p4  ;;  %189 = sbr.rel (%p2210_p3) target bundleno = 1362 (0x552), region = 36 }
   0xb   : > { %2060 = dma.hbm_to_vmem [thread:$0]  (!%p2058_p5), %s148_s18, 1536, %s150_s23, [#allocation3], %s2166_s29, %s2166_s29, %s2167_s30  }
   0xc   : > { %2063 = dma.hbm_to_vmem [thread:$0]  (!%p2058_p5), %s166_s26, 128, %s168_s28, [#allocation5]  }
   0xe   : > { %2153 = dma.done.wait (%p2206_p2), [#allocation3], 1536  }
   0xf   : > { %2155 = vsyncadd (%p2206_p2), [#allocation3], 4294965760 }
  0x10   : > { %2157 = dma.done.wait (%p2206_p2), [#allocation5], 128  }
  0x11   : > { %2159 = vsyncadd (%p2206_p2), [#allocation5], 4294967168  ;;  %v276_v0 = vld [vmem:[#allocation2 + $0x58] sm:$0xff]  ;;  %v275_v1 = vld [vmem:[#allocation2 + $0x50] sm:$0xff]  ;;  %s1915_s5 = sshll.u32 %s1906_s19, 5  ;;  %vm279_vm0 = vcmask 785408  }
  0x12   : > { %380 = vmatpush.msra.mxu0 %v276_v0  ;;  %v274_v2 = vld [vmem:[#allocation2 + $0x48] sm:$0xff]  ;;  %v273_v3 = vld [vmem:[#allocation2 + $0x40] sm:$0xff]  ;;  %v272_v4 = vld [vmem:[#allocation2 + $0x38] sm:$0xff]  ;;  %p222_p6 = scmp.lt.s32.totalorder %s1915_s5, 63 }
  0x13   : > { %v271_v5 = vld [vmem:[#allocation2 + $0x30] sm:$0xff]  ;;  %v270_v6 = vld [vmem:[#allocation2 + $0x28] sm:$0xff]  ;;  %v269_v7 = vld [vmem:[#allocation2 + $0x20] sm:$0xff] }
  0x14   : > { %381 = vmatpush.msra.mxu0 %v275_v1  ;;  %s2965_s5 = smov (!%p222_p6, %s1915_s5), 63  ;;  %v268_v8 = vld [vmem:[#allocation2 + $0x18] sm:$0xff]  ;;  %v267_v9 = vld [vmem:[#allocation2 + $0x10] sm:$0xff]  ;;  %v266_v10 = vld [vmem:[#allocation2 + $0x8] sm:$0xff] }
  0x15   : > { %s1916_s6 = sshll.u32 %s2965_s5, 3  ;;  %v265_v11 = vld [vmem:[#allocation2] sm:$0xff]  ;;  %v568_v21 = vld [vmem:[%s2959_s2 + $0x78] sm:$0xff]  ;;  %v567_v22 = vld [vmem:[%s2959_s2 + $0x70] sm:$0xff] }
  0x16   : > { %382 = vmatpush.msra.mxu0 %v274_v2  ;;  %s2241_s9 = scalar_lea.vmem %s2957_s0, %s1916_s6  ;;  %571 = vmatpush.msra.mxu1 %v568_v21  ;;  %v566_v24 = vld [vmem:[%s2959_s2 + $0x68] sm:$0xff]  ;;  %v565_v25 = vld [vmem:[%s2959_s2 + $0x60] sm:$0xff]  ;;  %v564_v26 = vld [vmem:[%s2959_s2 + $0x58] sm:$0xff]  ;;  %s2874_s8 = scalar_lea.vmem %s2961_s4, %s1916_s6 }
  0x17   : > { %v233_v12 = vld [vmem:[%s2241_s9] sm:$0xff]  ;;  %v234_v13 = vld [vmem:[%s2241_s9 + $0x8] sm:$0xff]  ;;  %v235_v14 = vld [vmem:[%s2241_s9 + $0x10] sm:$0xff] }
  0x18   : > { %383 = vmatpush.msra.mxu0 %v273_v3  ;;  %v236_v15 = vld [vmem:[%s2241_s9 + $0x18] sm:$0xff]  ;;  %v237_v16 = vld [vmem:[%s2241_s9 + $0x20] sm:$0xff]  ;;  %v238_v17 = vld [vmem:[%s2241_s9 + $0x28] sm:$0xff]  ;;  %572 = vmatpush.msra.mxu1 %v567_v22 }
  0x19   : > { %v239_v18 = vld [vmem:[%s2241_s9 + $0x30] sm:$0xff]  ;;  %v240_v19 = vld [vmem:[%s2241_s9 + $0x38] sm:$0xff]  ;;  %v241_v20 = vld [vmem:[%s2241_s9 + $0x40] sm:$0xff] }
  0x1a   : > { %384 = vmatpush.msra.mxu0 %v272_v4  ;;  %v242_v23 = vld [vmem:[%s2241_s9 + $0x48] sm:$0xff]  ;;  %573 = vmatpush.msra.mxu1 %v566_v24  ;;  %v563_v27 = vld [vmem:[%s2959_s2 + $0x50] sm:$0xff]  ;;  %v561_v30 = vld [vmem:[%s2959_s2 + $0x40] sm:$0xff] }
  0x1b   : > { %v243_v28 = vld [vmem:[%s2241_s9 + $0x50] sm:$0xff]  ;;  %v562_v29 = vld [vmem:[%s2959_s2 + $0x48] sm:$0xff]  ;;  %v560_v31 = vld [vmem:[%s2959_s2 + $0x38] sm:$0xff] }
  0x1c   : > { %385 = vmatpush.msra.mxu0 %v271_v5  ;;  %574 = vmatpush.msra.mxu1 %v565_v25  ;;  %v559_v32 = vld [vmem:[%s2959_s2 + $0x30] sm:$0xff]  ;;  %v244_v33 = vld [vmem:[%s2241_s9 + $0x58] sm:$0xff]  ;;  %v558_v34 = vld [vmem:[%s2959_s2 + $0x28] sm:$0xff] }
  0x1d   : > { %v557_v35 = vld [vmem:[%s2959_s2 + $0x20] sm:$0xff]  ;;  %v556_v36 = vld [vmem:[%s2959_s2 + $0x18] sm:$0xff]  ;;  %v555_v38 = vld [vmem:[%s2959_s2 + $0x10] sm:$0xff] }
  0x1e   : > { %386 = vmatpush.msra.mxu0 %v270_v6  ;;  %575 = vmatpush.msra.mxu1 %v564_v26  ;;  %v245_v37 = vld [vmem:[%s2241_s9 + $0x60] sm:$0xff]  ;;  %v554_v39 = vld [vmem:[%s2959_s2 + $0x8] sm:$0xff]  ;;  %v247_v42 = vld [vmem:[%s2241_s9 + $0x70] sm:$0xff] }
  0x1f   : > { %v553_v40 = vld [vmem:[%s2959_s2] sm:$0xff]  ;;  %v246_v41 = vld [vmem:[%s2241_s9 + $0x68] sm:$0xff]  ;;  %v248_v43 = vld [vmem:[%s2241_s9 + $0x78] sm:$0xff] }
  0x20   : > { %387 = vmatpush.msra.mxu0 %v269_v7  ;;  %576 = vmatpush.msra.mxu1 %v563_v27  ;;  %v2323_v44 = vld [vmem:[#allocation4] ss:$0 sm:$0xff]  ;;  %v250_v51 = vld [vmem:[%s2241_s9 + $0x88] sm:$0xff]  ;;  %v251_v56 = vld [vmem:[%s2241_s9 + $0x90] sm:$0xff] }
  0x21   : > { %v249_v46 = vld [vmem:[%s2241_s9 + $0x80] sm:$0xff]  ;;  %v252_v61 = vld [vmem:[%s2241_s9 + $0x98] sm:$0xff]  ;;  %v254_v7 = vld [vmem:[%s2241_s9 + $0xa8] sm:$0xff] }
  0x22   : > { %388 = vmatpush.msra.mxu0 %v268_v8  ;;  %577 = vmatpush.msra.mxu1 %v562_v29  ;;  %v253_v2 = vld [vmem:[%s2241_s9 + $0xa0] sm:$0xff]  ;;  %v258_v27 = vld [vmem:[%s2241_s9 + $0xc8] sm:$0xff] }
  0x23   : > { %v257_v22 = vld [vmem:[%s2241_s9 + $0xc0] sm:$0xff] }
  0x24   : > { %389 = vmatpush.msra.mxu0 %v267_v9  ;;  %578 = vmatpush.msra.mxu1 %v561_v30  ;;  %v1966_v30 = vld [vmem:[%s2959_s2 + $0xf8] sm:$0xff] }
  0x25   : > { %767 = vmatpush.msra.mxu2 %v1966_v30 }
  0x26   : > { %390 = vmatpush.msra.mxu0 %v266_v10  ;;  %579 = vmatpush.msra.mxu1 %v560_v31  ;;  %v1965_v31 = vld [vmem:[%s2959_s2 + $0xf0] sm:$0xff] }
  0x27   : > { %768 = vmatpush.msra.mxu2 %v1965_v31 }
  0x28   : > { %391 = vmatpush.msra.mxu0 %v265_v11  ;;  %580 = vmatpush.msra.mxu1 %v559_v32 }
  0x29   : > { %1919 = vmatmul.msk.f32.vlgmr.msra.gmra.mxu0 %vm279_vm0, %v233_v12  ;;  %v255_v12 = vld [vmem:[%s2241_s9 + $0xb0] sm:$0xff] }
  0x2a   : > { %581 = vmatpush.msra.mxu1 %v558_v34 }
  0x2c   : > { %582 = vmatpush.msra.mxu1 %v557_v35  ;;  %v259_v35 = vld [vmem:[%s2241_s9 + $0xd0] sm:$0xff] }
  0x2e   : > { %583 = vmatpush.msra.mxu1 %v556_v36 }
  0x30   : > { %584 = vmatpush.msra.mxu1 %v555_v38 }
  0x31   : > { %1920 = vmatmul.msk.f32.gmra.mxu0 %vm279_vm0, %v234_v13 }
  0x32   : > { %585 = vmatpush.msra.mxu1 %v554_v39  ;;  %v1962_v39 = vld [vmem:[%s2959_s2 + $0xd8] sm:$0xff] }
  0x34   : > { %586 = vmatpush.msra.mxu1 %v553_v40  ;;  %v1961_v40 = vld [vmem:[%s2959_s2 + $0xd0] sm:$0xff] }
  0x39   : > { %1921 = vmatmul.msk.f32.gmra.mxu0 %vm279_vm0, %v235_v14 }
  0x41   : > { %1922 = vmatmul.msk.f32.gmra.mxu0 %vm279_vm0, %v236_v15 }
  0x49   : > { %1923 = vmatmul.msk.f32.gmra.mxu0 %vm279_vm0, %v237_v16 }
  0x51   : > { %1924 = vmatmul.msk.f32.gmra.mxu0 %vm279_vm0, %v238_v17  ;;  %v256_v17 = vld [vmem:[%s2241_s9 + $0xb8] sm:$0xff] }
  0x59   : > { %1925 = vmatmul.msk.f32.gmra.mxu0 %vm279_vm0, %v239_v18 }
  0x61   : > { %1926 = vmatmul.msk.f32.gmra.mxu0 %vm279_vm0, %v240_v19 }
  0x69   : > { %1927 = vmatmul.msk.f32.gmra.mxu0 %vm279_vm0, %v241_v20 }
  0x71   : > { %1928 = vmatmul.msk.f32.gmra.mxu0 %vm279_vm0, %v242_v23 }
  0x79   : > { %1929 = vmatmul.msk.f32.gmra.mxu0 %vm279_vm0, %v243_v28 }
  0x81   : > { %1930 = vmatmul.msk.f32.gmra.mxu0 %vm279_vm0, %v244_v33  ;;  %v1964_v33 = vld [vmem:[%s2959_s2 + $0xe8] sm:$0xff] }
  0x82   : > { %769 = vmatpush.msra.mxu2 %v1964_v33 }
  0x89   : > { %1931 = vmatmul.msk.f32.gmra.mxu0 %vm279_vm0, %v245_v37  ;;  %v1963_v37 = vld [vmem:[%s2959_s2 + $0xe0] sm:$0xff] }
  0x8a   : > { %770 = vmatpush.msra.mxu2 %v1963_v37 }
  0x8c   : > { %771 = vmatpush.msra.mxu2 %v1962_v39 }
  0x8e   : > { %772 = vmatpush.msra.mxu2 %v1961_v40 }
  0x91   : > { %1932 = vmatmul.msk.f32.gmra.mxu0 %vm279_vm0, %v246_v41 }
  0x99   : > { %1933 = vmatmul.msk.f32.gmra.mxu0 %vm279_vm0, %v247_v42  ;;  %v1960_v42 = vld [vmem:[%s2959_s2 + $0xc8] sm:$0xff] }
  0x9a   : > { %773 = vmatpush.msra.mxu2 %v1960_v42 }
  0xa1   : > { %1934 = vmatmul.msk.f32.gmra.mxu0 %vm279_vm0, %v248_v43 }
  0xa6   : > { %v393_v45 = vpop.f32.mrf.mxu0 }
  0xa7   : > { %v394_v47 = vadd.f32 %v2323_v44, %v393_v45  ;;  %v260_v45 = vld [vmem:[%s2241_s9 + $0xd8] sm:$0xff] }
  0xa9   : > { %1935 = vmatmul.msk.f32.gmra.mxu0 %vm279_vm0, %v249_v46  ;;  %v489_v48 = vmul.f32 0.01, %v394_v47 }
  0xab   : > { %v521_v49 = vmax.f32 %v394_v47, %v489_v48  ;;  %v1959_v47 = vld [vmem:[%s2959_s2 + $0xc0] sm:$0xff] }
  0xac   : > { %774 = vmatpush.msra.mxu2 %v1959_v47 }
  0xad   : > { %587 = vmatmul.f32.vlgmr.msra.gmra.mxu1 %v521_v49  ;;  %v1958_v49 = vld [vmem:[%s2959_s2 + $0xb8] sm:$0xff] }
  0xae   : > { %v396_v50 = vpop.f32.mrf.mxu0  ;;  %775 = vmatpush.msra.mxu2 %v1958_v49 }
  0xaf   : > { %v397_v52 = vadd.f32 %v2323_v44, %v396_v50  ;;  %v1957_v50 = vld [vmem:[%s2959_s2 + $0xb0] sm:$0xff] }
  0xb0   : > { %776 = vmatpush.msra.mxu2 %v1957_v50 }
  0xb1   : > { %1936 = vmatmul.msk.f32.gmra.mxu0 %vm279_vm0, %v250_v51  ;;  %v490_v53 = vmul.f32 0.01, %v397_v52 }
  0xb3   : > { %v522_v54 = vmax.f32 %v397_v52, %v490_v53  ;;  %v1956_v52 = vld [vmem:[%s2959_s2 + $0xa8] sm:$0xff] }
  0xb4   : > { %777 = vmatpush.msra.mxu2 %v1956_v52 }
  0xb5   : > { %590 = vmatmul.f32.gmra.mxu1 %v522_v54  ;;  %v261_v54 = vld [vmem:[%s2241_s9 + $0xe0] sm:$0xff] }
  0xb6   : > { %v399_v55 = vpop.f32.mrf.mxu0 }
  0xb7   : > { %v400_v57 = vadd.f32 %v2323_v44, %v399_v55 }
  0xb9   : > { %1937 = vmatmul.msk.f32.gmra.mxu0 %vm279_vm0, %v251_v56  ;;  %v491_v58 = vmul.f32 0.01, %v400_v57  ;;  %v1955_v56 = vld [vmem:[%s2959_s2 + $0xa0] sm:$0xff] }
  0xba   : > { %778 = vmatpush.msra.mxu2 %v1955_v56 }
  0xbb   : > { %v523_v59 = vmax.f32 %v400_v57, %v491_v58  ;;  %v1954_v58 = vld [vmem:[%s2959_s2 + $0x98] sm:$0xff] }
  0xbc   : > { %779 = vmatpush.msra.mxu2 %v1954_v58 }
  0xbd   : > { %593 = vmatmul.f32.gmra.mxu1 %v523_v59 }
  0xbe   : > { %v402_v60 = vpop.f32.mrf.mxu0 }
  0xbf   : > { %v403_v62 = vadd.f32 %v2323_v44, %v402_v60  ;;  %v1953_v60 = vld [vmem:[%s2959_s2 + $0x90] sm:$0xff] }
  0xc0   : > { %780 = vmatpush.msra.mxu2 %v1953_v60 }
  0xc1   : > { %1938 = vmatmul.msk.f32.gmra.mxu0 %vm279_vm0, %v252_v61  ;;  %v492_v63 = vmul.f32 0.01, %v403_v62  ;;  %v1952_v61 = vld [vmem:[%s2959_s2 + $0x88] sm:$0xff] }
  0xc2   : > { %781 = vmatpush.msra.mxu2 %v1952_v61 }
  0xc3   : > { %v524_v0 = vmax.f32 %v403_v62, %v492_v63  ;;  %v262_v63 = vld [vmem:[%s2241_s9 + $0xe8] sm:$0xff] }
  0xc5   : > { %596 = vmatmul.f32.gmra.mxu1 %v524_v0 }
  0xc6   : > { %v405_v1 = vpop.f32.mrf.mxu0 }
  0xc7   : > { %v406_v3 = vadd.f32 %v2323_v44, %v405_v1  ;;  %v1951_v1 = vld [vmem:[%s2959_s2 + $0x80] sm:$0xff] }
  0xc8   : > { %782 = vmatpush.msra.mxu2 %v1951_v1  ;;  %v1995_v1 = vld [vmem:[%s2959_s2 + $0x1e0] sm:$0xff] }
  0xc9   : > { %1939 = vmatmul.msk.f32.gmra.mxu0 %vm279_vm0, %v253_v2  ;;  %v493_v4 = vmul.f32 0.01, %v406_v3 }
  0xcb   : > { %v525_v5 = vmax.f32 %v406_v3, %v493_v4 }
  0xcd   : > { %599 = vmatmul.f32.gmra.mxu1 %v525_v5  ;;  %v263_v5 = vld [vmem:[%s2241_s9 + $0xf0] sm:$0xff] }
  0xce   : > { %v408_v6 = vpop.f32.mrf.mxu0 }
  0xcf   : > { %v409_v8 = vadd.f32 %v2323_v44, %v408_v6 }
  0xd1   : > { %1940 = vmatmul.msk.f32.gmra.mxu0 %vm279_vm0, %v254_v7  ;;  %v494_v9 = vmul.f32 0.01, %v409_v8 }
  0xd3   : > { %v526_v10 = vmax.f32 %v409_v8, %v494_v9 }
  0xd5   : > { %602 = vmatmul.f32.gmra.mxu1 %v526_v10  ;;  %v264_v10 = vld [vmem:[%s2241_s9 + $0xf8] sm:$0xff] }
  0xd6   : > { %v411_v11 = vpop.f32.mrf.mxu0 }
  0xd7   : > { %v412_v13 = vadd.f32 %v2323_v44, %v411_v11 }
  0xd9   : > { %1941 = vmatmul.msk.f32.gmra.mxu0 %vm279_vm0, %v255_v12  ;;  %v495_v14 = vmul.f32 0.01, %v412_v13 }
  0xdb   : > { %v527_v15 = vmax.f32 %v412_v13, %v495_v14  ;;  %v1998_v13 = vld [vmem:[%s2959_s2 + $0x1f8] sm:$0xff] }
  0xdc   : > { %1095 = vmatpush.msrb.mxu0 %v1998_v13 }
  0xdd   : > { %605 = vmatmul.f32.gmra.mxu1 %v527_v15 }
  0xde   : > { %v414_v16 = vpop.f32.mrf.mxu0 }
  0xdf   : > { %v415_v18 = vadd.f32 %v2323_v44, %v414_v16 }
  0xe1   : > { %1942 = vmatmul.msk.f32.gmra.mxu0 %vm279_vm0, %v256_v17  ;;  %v496_v19 = vmul.f32 0.01, %v415_v18  ;;  %v2425_v17 = vld [vmem:[#allocation4 + $0x1] ss:$0 sm:$0xff] }
  0xe3   : > { %v528_v20 = vmax.f32 %v415_v18, %v496_v19 }
  0xe5   : > { %608 = vmatmul.f32.gmra.mxu1 %v528_v20 }
  0xe6   : > { %v417_v21 = vpop.f32.mrf.mxu0 }
  0xe7   : > { %v418_v23 = vadd.f32 %v2323_v44, %v417_v21 }
  0xe9   : > { %1943 = vmatmul.msk.f32.gmra.mxu0 %vm279_vm0, %v257_v22  ;;  %v497_v24 = vmul.f32 0.01, %v418_v23 }
  0xeb   : > { %v529_v25 = vmax.f32 %v418_v23, %v497_v24 }
  0xed   : > { %611 = vmatmul.f32.gmra.mxu1 %v529_v25 }
  0xee   : > { %v420_v26 = vpop.f32.mrf.mxu0 }
  0xef   : > { %v421_v28 = vadd.f32 %v2323_v44, %v420_v26 }
  0xf1   : > { %1944 = vmatmul.msk.f32.gmra.mxu0 %vm279_vm0, %v258_v27  ;;  %v498_v29 = vmul.f32 0.01, %v421_v28  ;;  %v1997_v27 = vld [vmem:[%s2959_s2 + $0x1f0] sm:$0xff] }
  0xf2   : > { %1096 = vmatpush.msrb.mxu0 %v1997_v27 }
  0xf3   : > { %v530_v32 = vmax.f32 %v421_v28, %v498_v29 }
  0xf5   : > { %614 = vmatmul.f32.gmra.mxu1 %v530_v32 }
  0xf6   : > { %v423_v34 = vpop.f32.mrf.mxu0 }
  0xf7   : > { %v424_v36 = vadd.f32 %v2323_v44, %v423_v34 }
  0xf9   : > { %1945 = vmatmul.msk.f32.gmra.mxu0 %vm279_vm0, %v259_v35  ;;  %v499_v38 = vmul.f32 0.01, %v424_v36 }
  0xfb   : > { %v531_v41 = vmax.f32 %v424_v36, %v499_v38 }
  0xfd   : > { %617 = vmatmul.f32.gmra.mxu1 %v531_v41 }
  0xfe   : > { %v426_v43 = vpop.f32.mrf.mxu0 }
  0xff   : > { %v427_v46 = vadd.f32 %v2323_v44, %v426_v43 }
 0x101   : > { %1946 = vmatmul.msk.f32.gmra.mxu0 %vm279_vm0, %v260_v45  ;;  %v500_v48 = vmul.f32 0.01, %v427_v46  ;;  %v1996_v45 = vld [vmem:[%s2959_s2 + $0x1e8] sm:$0xff] }
 0x102   : > { %1097 = vmatpush.msrb.mxu0 %v1996_v45 }
 0x103   : > { %v532_v51 = vmax.f32 %v427_v46, %v500_v48 }
 0x104   : > { %1098 = vmatpush.msrb.mxu0 %v1995_v1 }
 0x105   : > { %620 = vmatmul.f32.gmra.mxu1 %v532_v51 }
 0x106   : > { %v429_v53 = vpop.f32.mrf.mxu0 }
 0x107   : > { %v430_v55 = vadd.f32 %v2323_v44, %v429_v53 }
 0x109   : > { %1947 = vmatmul.msk.f32.gmra.mxu0 %vm279_vm0, %v261_v54  ;;  %v501_v57 = vmul.f32 0.01, %v430_v55 }
 0x10b   : > { %v533_v59 = vmax.f32 %v430_v55, %v501_v57 }
 0x10d   : > { %623 = vmatmul.f32.gmra.mxu1 %v533_v59 }
 0x10e   : > { %v432_v62 = vpop.f32.mrf.mxu0 }
 0x10f   : > { %v433_v0 = vadd.f32 %v2323_v44, %v432_v62 }
 0x111   : > { %1948 = vmatmul.msk.f32.gmra.mxu0 %vm279_vm0, %v262_v63  ;;  %v502_v2 = vmul.f32 0.01, %v433_v0 }
 0x113   : > { %v534_v3 = vmax.f32 %v433_v0, %v502_v2 }
 0x115   : > { %626 = vmatmul.f32.gmra.mxu1 %v534_v3 }
 0x116   : > { %v435_v4 = vpop.f32.mrf.mxu0 }
 0x117   : > { %v436_v6 = vadd.f32 %v2323_v44, %v435_v4 }
 0x119   : > { %1949 = vmatmul.msk.f32.gmra.mxu0 %vm279_vm0, %v263_v5  ;;  %v503_v7 = vmul.f32 0.01, %v436_v6 }
 0x11b   : > { %v535_v8 = vmax.f32 %v436_v6, %v503_v7 }
 0x11d   : > { %629 = vmatmul.f32.gmra.mxu1 %v535_v8 }
 0x11e   : > { %v438_v9 = vpop.f32.mrf.mxu0 }
 0x11f   : > { %v439_v11 = vadd.f32 %v2323_v44, %v438_v9 }
 0x121   : > { %1950 = vmatmul.msk.f32.gmra.mxu0 %vm279_vm0, %v264_v10  ;;  %v504_v12 = vmul.f32 0.01, %v439_v11 }
 0x123   : > { %v536_v14 = vmax.f32 %v439_v11, %v504_v12 }
 0x125   : > { %632 = vmatmul.f32.gmra.mxu1 %v536_v14 }
 0x126   : > { %v441_v15 = vpop.f32.mrf.mxu0 }
 0x127   : > { %v442_v16 = vadd.f32 %v2323_v44, %v441_v15 }
 0x129   : > { %v505_v18 = vmul.f32 0.01, %v442_v16 }
 0x12a   : > { %v588_v19 = vpop.f32.mrf.mxu1 }
 0x12b   : > { %v589_v20 = vadd.f32 %v2425_v17, %v588_v19  ;;  %v537_v21 = vmax.f32 %v442_v16, %v505_v18  ;;  %v1994_v19 = vld [vmem:[%s2959_s2 + $0x1d8] sm:$0xff] }
 0x12c   : > { %1099 = vmatpush.msrb.mxu0 %v1994_v19 }
 0x12d   : > { %635 = vmatmul.f32.gmra.mxu1 %v537_v21  ;;  %v684_v22 = vmul.f32 0.01, %v589_v20 }
 0x12e   : > { %v444_v23 = vpop.f32.mrf.mxu0 }
 0x12f   : > { %v445_v24 = vadd.f32 %v2323_v44, %v444_v23  ;;  %v716_v25 = vmax.f32 %v589_v20, %v684_v22 }
 0x131   : > { %783 = vmatmul.f32.vlgmr.msra.gmra.mxu2 %v716_v25  ;;  %v506_v26 = vmul.f32 0.01, %v445_v24 }
 0x132   : > { %v591_v28 = vpop.f32.mrf.mxu1 }
 0x133   : > { %v592_v29 = vadd.f32 %v2425_v17, %v591_v28  ;;  %v538_v30 = vmax.f32 %v445_v24, %v506_v26 }
 0x135   : > { %638 = vmatmul.f32.gmra.mxu1 %v538_v30  ;;  %v685_v31 = vmul.f32 0.01, %v592_v29 }
 0x136   : > { %v447_v32 = vpop.f32.mrf.mxu0 }
 0x137   : > { %v448_v33 = vadd.f32 %v2323_v44, %v447_v32  ;;  %v717_v34 = vmax.f32 %v592_v29, %v685_v31 }
 0x139   : > { %786 = vmatmul.f32.gmra.mxu2 %v717_v34  ;;  %v507_v35 = vmul.f32 0.01, %v448_v33 }
 0x13a   : > { %v594_v36 = vpop.f32.mrf.mxu1 }
 0x13b   : > { %v595_v37 = vadd.f32 %v2425_v17, %v594_v36  ;;  %v539_v38 = vmax.f32 %v448_v33, %v507_v35  ;;  %v1993_v36 = vld [vmem:[%s2959_s2 + $0x1d0] sm:$0xff] }
 0x13c   : > { %1100 = vmatpush.msrb.mxu0 %v1993_v36 }
 0x13d   : > { %641 = vmatmul.f32.gmra.mxu1 %v539_v38  ;;  %v686_v39 = vmul.f32 0.01, %v595_v37 }
 0x13e   : > { %v450_v40 = vpop.f32.mrf.mxu0 }
 0x13f   : > { %v451_v41 = vadd.f32 %v2323_v44, %v450_v40  ;;  %v718_v42 = vmax.f32 %v595_v37, %v686_v39 }
 0x141   : > { %789 = vmatmul.f32.gmra.mxu2 %v718_v42  ;;  %v508_v43 = vmul.f32 0.01, %v451_v41 }
 0x142   : > { %v597_v46 = vpop.f32.mrf.mxu1 }
 0x143   : > { %v598_v47 = vadd.f32 %v2425_v17, %v597_v46  ;;  %v540_v48 = vmax.f32 %v451_v41, %v508_v43  ;;  %v1982_v46 = vld [vmem:[%s2959_s2 + $0x178] sm:$0xff] }
 0x144   : > { %963 = vmatpush.msra.mxu3 %v1982_v46 }
 0x145   : > { %644 = vmatmul.f32.gmra.mxu1 %v540_v48  ;;  %v687_v49 = vmul.f32 0.01, %v598_v47  ;;  %v1981_v48 = vld [vmem:[%s2959_s2 + $0x170] sm:$0xff] }
 0x146   : > { %v453_v50 = vpop.f32.mrf.mxu0  ;;  %964 = vmatpush.msra.mxu3 %v1981_v48 }
 0x147   : > { %v454_v51 = vadd.f32 %v2323_v44, %v453_v50  ;;  %v719_v52 = vmax.f32 %v598_v47, %v687_v49 }
 0x149   : > { %792 = vmatmul.f32.gmra.mxu2 %v719_v52  ;;  %v509_v53 = vmul.f32 0.01, %v454_v51  ;;  %v1980_v52 = vld [vmem:[%s2959_s2 + $0x168] sm:$0xff] }
 0x14a   : > { %v600_v54 = vpop.f32.mrf.mxu1  ;;  %965 = vmatpush.msra.mxu3 %v1980_v52 }
 0x14b   : > { %v601_v55 = vadd.f32 %v2425_v17, %v600_v54  ;;  %v541_v56 = vmax.f32 %v454_v51, %v509_v53  ;;  %v1979_v54 = vld [vmem:[%s2959_s2 + $0x160] sm:$0xff] }
 0x14c   : > { %966 = vmatpush.msra.mxu3 %v1979_v54 }
 0x14d   : > { %647 = vmatmul.f32.gmra.mxu1 %v541_v56  ;;  %v688_v57 = vmul.f32 0.01, %v601_v55 }
 0x14e   : > { %v456_v58 = vpop.f32.mrf.mxu0 }
 0x14f   : > { %v457_v59 = vadd.f32 %v2323_v44, %v456_v58  ;;  %v720_v60 = vmax.f32 %v601_v55, %v688_v57  ;;  %v1992_v58 = vld [vmem:[%s2959_s2 + $0x1c8] sm:$0xff] }
 0x150   : > { %1101 = vmatpush.msrb.mxu0 %v1992_v58 }
 0x151   : > { %795 = vmatmul.f32.gmra.mxu2 %v720_v60  ;;  %v510_v61 = vmul.f32 0.01, %v457_v59 }
 0x152   : > { %v603_v62 = vpop.f32.mrf.mxu1 }
 0x153   : > { %v604_v63 = vadd.f32 %v2425_v17, %v603_v62  ;;  %v542_v0 = vmax.f32 %v457_v59, %v510_v61  ;;  %v1978_v59 = vld [vmem:[%s2959_s2 + $0x158] sm:$0xff]  ;;  %v1977_v61 = vld [vmem:[%s2959_s2 + $0x150] sm:$0xff]  ;;  %v1976_v62 = vld [vmem:[%s2959_s2 + $0x148] sm:$0xff] }
 0x154   : > { %967 = vmatpush.msra.mxu3 %v1978_v59 }
 0x155   : > { %650 = vmatmul.f32.gmra.mxu1 %v542_v0  ;;  %v689_v2 = vmul.f32 0.01, %v604_v63 }
 0x156   : > { %v459_v3 = vpop.f32.mrf.mxu0  ;;  %968 = vmatpush.msra.mxu3 %v1977_v61 }
 0x157   : > { %v460_v4 = vadd.f32 %v2323_v44, %v459_v3  ;;  %v721_v5 = vmax.f32 %v604_v63, %v689_v2  ;;  %v1975_v3 = vld [vmem:[%s2959_s2 + $0x140] sm:$0xff] }
 0x158   : > { %969 = vmatpush.msra.mxu3 %v1976_v62 }
 0x159   : > { %798 = vmatmul.f32.gmra.mxu2 %v721_v5  ;;  %v511_v6 = vmul.f32 0.01, %v460_v4 }
 0x15a   : > { %v606_v7 = vpop.f32.mrf.mxu1  ;;  %970 = vmatpush.msra.mxu3 %v1975_v3 }
 0x15b   : > { %v607_v8 = vadd.f32 %v2425_v17, %v606_v7  ;;  %v543_v9 = vmax.f32 %v460_v4, %v511_v6  ;;  %v1974_v7 = vld [vmem:[%s2959_s2 + $0x138] sm:$0xff] }
 0x15c   : > { %971 = vmatpush.msra.mxu3 %v1974_v7 }
 0x15d   : > { %653 = vmatmul.f32.gmra.mxu1 %v543_v9  ;;  %v690_v10 = vmul.f32 0.01, %v607_v8 }
 0x15e   : > { %v462_v11 = vpop.f32.mrf.mxu0 }
 0x15f   : > { %v463_v12 = vadd.f32 %v2323_v44, %v462_v11  ;;  %v722_v13 = vmax.f32 %v607_v8, %v690_v10  ;;  %v1973_v8 = vld [vmem:[%s2959_s2 + $0x130] sm:$0xff]  ;;  %v1972_v10 = vld [vmem:[%s2959_s2 + $0x128] sm:$0xff] }
 0x160   : > { %972 = vmatpush.msra.mxu3 %v1973_v8 }
 0x161   : > { %801 = vmatmul.f32.gmra.mxu2 %v722_v13  ;;  %v512_v14 = vmul.f32 0.01, %v463_v12 }
 0x162   : > { %v609_v15 = vpop.f32.mrf.mxu1  ;;  %973 = vmatpush.msra.mxu3 %v1972_v10  ;;  %v2012_v10 = vld [vmem:[%s2959_s2 + $0x268] sm:$0xff] }
 0x163   : > { %v610_v16 = vadd.f32 %v2425_v17, %v609_v15  ;;  %v544_v18 = vmax.f32 %v463_v12, %v512_v14  ;;  %v1991_v15 = vld [vmem:[%s2959_s2 + $0x1c0] sm:$0xff] }
 0x164   : > { %1102 = vmatpush.msrb.mxu0 %v1991_v15 }
 0x165   : > { %656 = vmatmul.f32.gmra.mxu1 %v544_v18  ;;  %v691_v20 = vmul.f32 0.01, %v610_v16 }
 0x166   : > { %v465_v21 = vpop.f32.mrf.mxu0 }
 0x167   : > { %v466_v22 = vadd.f32 %v2323_v44, %v465_v21  ;;  %v723_v23 = vmax.f32 %v610_v16, %v691_v20  ;;  %v1971_v16 = vld [vmem:[%s2959_s2 + $0x120] sm:$0xff]  ;;  %v1970_v21 = vld [vmem:[%s2959_s2 + $0x118] sm:$0xff] }
 0x168   : > { %974 = vmatpush.msra.mxu3 %v1971_v16 }
 0x169   : > { %v513_v24 = vmul.f32 0.01, %v466_v22  ;;  %804 = vmatmul.f32.gmra.mxu2 %v723_v23  ;;  %v1969_v23 = vld [vmem:[%s2959_s2 + $0x110] sm:$0xff] }
 0x16a   : > { %v612_v25 = vpop.f32.mrf.mxu1  ;;  %975 = vmatpush.msra.mxu3 %v1970_v21 }
 0x16b   : > { %v545_v26 = vmax.f32 %v466_v22, %v513_v24  ;;  %v613_v27 = vadd.f32 %v2425_v17, %v612_v25  ;;  %v1968_v24 = vld [vmem:[%s2959_s2 + $0x108] sm:$0xff] }
 0x16c   : > { %976 = vmatpush.msra.mxu3 %v1969_v23  ;;  %v1987_v23 = vld [vmem:[%s2959_s2 + $0x1a0] sm:$0xff] }
 0x16d   : > { %659 = vmatmul.f32.gmra.mxu1 %v545_v26  ;;  %v692_v28 = vmul.f32 0.01, %v613_v27 }
 0x16e   : > { %v468_v29 = vpop.f32.mrf.mxu0  ;;  %977 = vmatpush.msra.mxu3 %v1968_v24 }
 0x16f   : > { %v469_v30 = vadd.f32 %v2323_v44, %v468_v29  ;;  %v724_v31 = vmax.f32 %v613_v27, %v692_v28  ;;  %v1967_v29 = vld [vmem:[%s2959_s2 + $0x100] sm:$0xff] }
 0x170   : > { %978 = vmatpush.msra.mxu3 %v1967_v29 }
 0x171   : > { %v514_v32 = vmul.f32 0.01, %v469_v30  ;;  %807 = vmatmul.f32.gmra.mxu2 %v724_v31 }
 0x172   : > { %v615_v33 = vpop.f32.mrf.mxu1 }
 0x173   : > { %v546_v34 = vmax.f32 %v469_v30, %v514_v32  ;;  %v616_v35 = vadd.f32 %v2425_v17, %v615_v33 }
 0x175   : > { %662 = vmatmul.f32.gmra.mxu1 %v546_v34  ;;  %v693_v37 = vmul.f32 0.01, %v616_v35 }
 0x176   : > { %v471_v38 = vpop.f32.mrf.mxu0 }
 0x177   : > { %v472_v39 = vadd.f32 %v2323_v44, %v471_v38  ;;  %v725_v40 = vmax.f32 %v616_v35, %v693_v37  ;;  %v1990_v38 = vld [vmem:[%s2959_s2 + $0x1b8] sm:$0xff] }
 0x178   : > { %1103 = vmatpush.msrb.mxu0 %v1990_v38 }
 0x179   : > { %v515_v41 = vmul.f32 0.01, %v472_v39  ;;  %810 = vmatmul.f32.gmra.mxu2 %v725_v40 }
 0x17a   : > { %v618_v42 = vpop.f32.mrf.mxu1 }
 0x17b   : > { %v547_v43 = vmax.f32 %v472_v39, %v515_v41  ;;  %v619_v45 = vadd.f32 %v2425_v17, %v618_v42 }
 0x17d   : > { %665 = vmatmul.f32.gmra.mxu1 %v547_v43  ;;  %v694_v47 = vmul.f32 0.01, %v619_v45  ;;  %v2014_v43 = vld [vmem:[%s2959_s2 + $0x278] sm:$0xff] }
 0x17e   : > { %v474_v49 = vpop.f32.mrf.mxu0  ;;  %1291 = vmatpush.msrb.mxu1 %v2014_v43 }
 0x17f   : > { %v475_v50 = vadd.f32 %v2323_v44, %v474_v49  ;;  %v726_v51 = vmax.f32 %v619_v45, %v694_v47  ;;  %v2534_v49 = vld [vmem:[#allocation4 + $0x2] ss:$0 sm:$0xff] }
 0x181   : > { %v516_v53 = vmul.f32 0.01, %v475_v50  ;;  %813 = vmatmul.f32.gmra.mxu2 %v726_v51 }
 0x182   : > { %v621_v55 = vpop.f32.mrf.mxu1 }
 0x183   : > { %v548_v56 = vmax.f32 %v475_v50, %v516_v53  ;;  %v622_v57 = vadd.f32 %v2425_v17, %v621_v55  ;;  %v1989_v50 = vld [vmem:[%s2959_s2 + $0x1b0] sm:$0xff] }
 0x184   : > { %1104 = vmatpush.msrb.mxu0 %v1989_v50  ;;  %v2010_v50 = vld [vmem:[%s2959_s2 + $0x258] sm:$0xff] }
 0x185   : > { %668 = vmatmul.f32.gmra.mxu1 %v548_v56  ;;  %v695_v60 = vmul.f32 0.01, %v622_v57  ;;  %v2013_v56 = vld [vmem:[%s2959_s2 + $0x270] sm:$0xff] }
 0x186   : > { %v477_v63 = vpop.f32.mrf.mxu0  ;;  %1292 = vmatpush.msrb.mxu1 %v2013_v56 }
 0x187   : > { %v478_v0 = vadd.f32 %v2323_v44, %v477_v63  ;;  %v727_v1 = vmax.f32 %v622_v57, %v695_v60 }
 0x188   : > { %1293 = vmatpush.msrb.mxu1 %v2012_v10 }
 0x189   : > { %v517_v2 = vmul.f32 0.01, %v478_v0  ;;  %816 = vmatmul.f32.gmra.mxu2 %v727_v1 }
 0x18a   : > { %v624_v4 = vpop.f32.mrf.mxu1 }
 0x18b   : > { %v549_v5 = vmax.f32 %v478_v0, %v517_v2  ;;  %v625_v6 = vadd.f32 %v2425_v17, %v624_v4  ;;  %v1988_v4 = vld [vmem:[%s2959_s2 + $0x1a8] sm:$0xff] }
 0x18c   : > { %1105 = vmatpush.msrb.mxu0 %v1988_v4  ;;  %v2009_v4 = vld [vmem:[%s2959_s2 + $0x250] sm:$0xff] }
 0x18d   : > { %671 = vmatmul.f32.gmra.mxu1 %v549_v5  ;;  %v696_v9 = vmul.f32 0.01, %v625_v6 }
 0x18e   : > { %v480_v11 = vpop.f32.mrf.mxu0  ;;  %1106 = vmatpush.msrb.mxu0 %v1987_v23  ;;  %v2008_v23 = vld [vmem:[%s2959_s2 + $0x248] sm:$0xff] }
 0x18f   : > { %v481_v12 = vadd.f32 %v2323_v44, %v480_v11  ;;  %v728_v13 = vmax.f32 %v625_v6, %v696_v9 }
 0x191   : > { %v518_v14 = vmul.f32 0.01, %v481_v12  ;;  %819 = vmatmul.f32.gmra.mxu2 %v728_v13 }
 0x192   : > { %v627_v18 = vpop.f32.mrf.mxu1 }
 0x193   : > { %v550_v19 = vmax.f32 %v481_v12, %v518_v14  ;;  %v628_v20 = vadd.f32 %v2425_v17, %v627_v18 }
 0x195   : > { %674 = vmatmul.f32.gmra.mxu1 %v550_v19  ;;  %v697_v22 = vmul.f32 0.01, %v628_v20 }
 0x196   : > { %v483_v25 = vpop.f32.mrf.mxu0 }
 0x197   : > { %v484_v26 = vadd.f32 %v2323_v44, %v483_v25  ;;  %v729_v27 = vmax.f32 %v628_v20, %v697_v22 }
 0x199   : > { %v519_v28 = vmul.f32 0.01, %v484_v26  ;;  %822 = vmatmul.f32.gmra.mxu2 %v729_v27 }
 0x19a   : > { %v630_v30 = vpop.f32.mrf.mxu1 }
 0x19b   : > { %v551_v31 = vmax.f32 %v484_v26, %v519_v28  ;;  %v631_v32 = vadd.f32 %v2425_v17, %v630_v30 }
 0x19d   : > { %677 = vmatmul.f32.gmra.mxu1 %v551_v31  ;;  %v698_v33 = vmul.f32 0.01, %v631_v32  ;;  %v2011_v31 = vld [vmem:[%s2959_s2 + $0x260] sm:$0xff] }
 0x19e   : > { %v486_v34 = vpop.f32.mrf.mxu0  ;;  %1294 = vmatpush.msrb.mxu1 %v2011_v31 }
 0x19f   : > { %v487_v35 = vadd.f32 %v2323_v44, %v486_v34  ;;  %v730_v36 = vmax.f32 %v631_v32, %v698_v33 }
 0x1a0   : > { %1295 = vmatpush.msrb.mxu1 %v2010_v50 }
 0x1a1   : > { %v520_v37 = vmul.f32 0.01, %v487_v35  ;;  %825 = vmatmul.f32.gmra.mxu2 %v730_v36 }
 0x1a2   : > { %v633_v39 = vpop.f32.mrf.mxu1  ;;  %1296 = vmatpush.msrb.mxu1 %v2009_v4 }
 0x1a3   : > { %v552_v40 = vmax.f32 %v487_v35, %v520_v37  ;;  %v634_v41 = vadd.f32 %v2425_v17, %v633_v39 }
 0x1a4   : > { %1297 = vmatpush.msrb.mxu1 %v2008_v23 }
 0x1a5   : > { %680 = vmatmul.f32.gmra.mxu1 %v552_v40  ;;  %v699_v42 = vmul.f32 0.01, %v634_v41 }
 0x1a7   : > { %v731_v44 = vmax.f32 %v634_v41, %v699_v42  ;;  %v1986_v41 = vld [vmem:[%s2959_s2 + $0x198] sm:$0xff] }
 0x1a8   : > { %1107 = vmatpush.msrb.mxu0 %v1986_v41 }
 0x1a9   : > { %828 = vmatmul.f32.gmra.mxu2 %v731_v44 }
 0x1aa   : > { %v636_v45 = vpop.f32.mrf.mxu1 }
 0x1ab   : > { %v637_v46 = vadd.f32 %v2425_v17, %v636_v45 }
 0x1ad   : > { %v700_v47 = vmul.f32 0.01, %v637_v46 }
 0x1af   : > { %v732_v48 = vmax.f32 %v637_v46, %v700_v47 }
 0x1b1   : > { %831 = vmatmul.f32.gmra.mxu2 %v732_v48 }
 0x1b2   : > { %v639_v51 = vpop.f32.mrf.mxu1 }
 0x1b3   : > { %v640_v52 = vadd.f32 %v2425_v17, %v639_v51 }
 0x1b4   : > { %v784_v53 = vpop.f32.mrf.mxu2 }
 0x1b5   : > { %v785_v54 = vadd.f32 %v2534_v49, %v784_v53  ;;  %v701_v55 = vmul.f32 0.01, %v640_v52 }
 0x1b7   : > { %v733_v57 = vmax.f32 %v640_v52, %v701_v55  ;;  %v880_v58 = vmul.f32 0.01, %v785_v54 }
 0x1b9   : > { %834 = vmatmul.f32.gmra.mxu2 %v733_v57  ;;  %v912_v59 = vmax.f32 %v785_v54, %v880_v58 }
 0x1ba   : > { %v642_v60 = vpop.f32.mrf.mxu1 }
 0x1bb   : > { %v643_v61 = vadd.f32 %v2425_v17, %v642_v60  ;;  %979 = vmatmul.f32.vlgmr.msra.gmra.mxu3 %v912_v59  ;;  %v1985_v60 = vld [vmem:[%s2959_s2 + $0x190] sm:$0xff] }
 0x1bc   : > { %v787_v62 = vpop.f32.mrf.mxu2  ;;  %1108 = vmatpush.msrb.mxu0 %v1985_v60 }
 0x1bd   : > { %v788_v63 = vadd.f32 %v2534_v49, %v787_v62  ;;  %v702_v0 = vmul.f32 0.01, %v643_v61 }
 0x1bf   : > { %v734_v1 = vmax.f32 %v643_v61, %v702_v0  ;;  %v881_v2 = vmul.f32 0.01, %v788_v63 }
 0x1c1   : > { %837 = vmatmul.f32.gmra.mxu2 %v734_v1  ;;  %v913_v3 = vmax.f32 %v788_v63, %v881_v2 }
 0x1c2   : > { %v645_v5 = vpop.f32.mrf.mxu1 }
 0x1c3   : > { %v646_v6 = vadd.f32 %v2425_v17, %v645_v5  ;;  %982 = vmatmul.f32.gmra.mxu3 %v913_v3 }
 0x1c4   : > { %v790_v7 = vpop.f32.mrf.mxu2 }
 0x1c5   : > { %v791_v8 = vadd.f32 %v2534_v49, %v790_v7  ;;  %v703_v9 = vmul.f32 0.01, %v646_v6 }
 0x1c7   : > { %v735_v11 = vmax.f32 %v646_v6, %v703_v9  ;;  %v882_v12 = vmul.f32 0.01, %v791_v8 }
 0x1c9   : > { %840 = vmatmul.f32.gmra.mxu2 %v735_v11  ;;  %v914_v13 = vmax.f32 %v791_v8, %v882_v12 }
 0x1ca   : > { %v648_v14 = vpop.f32.mrf.mxu1 }
 0x1cb   : > { %v649_v15 = vadd.f32 %v2425_v17, %v648_v14  ;;  %985 = vmatmul.f32.gmra.mxu3 %v914_v13  ;;  %v1984_v14 = vld [vmem:[%s2959_s2 + $0x188] sm:$0xff] }
 0x1cc   : > { %v793_v16 = vpop.f32.mrf.mxu2  ;;  %1109 = vmatpush.msrb.mxu0 %v1984_v14 }
 0x1cd   : > { %v794_v18 = vadd.f32 %v2534_v49, %v793_v16  ;;  %v704_v19 = vmul.f32 0.01, %v649_v15 }
 0x1cf   : > { %v736_v20 = vmax.f32 %v649_v15, %v704_v19  ;;  %v883_v21 = vmul.f32 0.01, %v794_v18 }
 0x1d1   : > { %843 = vmatmul.f32.gmra.mxu2 %v736_v20  ;;  %v915_v22 = vmax.f32 %v794_v18, %v883_v21 }
 0x1d2   : > { %v651_v24 = vpop.f32.mrf.mxu1 }
 0x1d3   : > { %v652_v25 = vadd.f32 %v2425_v17, %v651_v24  ;;  %988 = vmatmul.f32.gmra.mxu3 %v915_v22 }
 0x1d4   : > { %v796_v26 = vpop.f32.mrf.mxu2 }
 0x1d5   : > { %v797_v27 = vadd.f32 %v2534_v49, %v796_v26  ;;  %v705_v28 = vmul.f32 0.01, %v652_v25 }
 0x1d7   : > { %v737_v29 = vmax.f32 %v652_v25, %v705_v28  ;;  %v884_v30 = vmul.f32 0.01, %v797_v27 }
 0x1d9   : > { %846 = vmatmul.f32.gmra.mxu2 %v737_v29  ;;  %v916_v32 = vmax.f32 %v797_v27, %v884_v30  ;;  %v1983_v30 = vld [vmem:[%s2959_s2 + $0x180] sm:$0xff] }
 0x1da   : > { %v654_v33 = vpop.f32.mrf.mxu1  ;;  %1110 = vmatpush.msrb.mxu0 %v1983_v30 }
 0x1db   : > { %v655_v34 = vadd.f32 %v2425_v17, %v654_v33  ;;  %991 = vmatmul.f32.gmra.mxu3 %v916_v32 }
 0x1dc   : > { %v799_v35 = vpop.f32.mrf.mxu2 }
 0x1dd   : > { %v800_v36 = vadd.f32 %v2534_v49, %v799_v35  ;;  %v706_v37 = vmul.f32 0.01, %v655_v34 }
 0x1df   : > { %v738_v38 = vmax.f32 %v655_v34, %v706_v37  ;;  %v885_v39 = vmul.f32 0.01, %v800_v36 }
 0x1e1   : > { %849 = vmatmul.f32.gmra.mxu2 %v738_v38  ;;  %v917_v40 = vmax.f32 %v800_v36, %v885_v39  ;;  %v2007_v39 = vld [vmem:[%s2959_s2 + $0x240] sm:$0xff] }
 0x1e2   : > { %v657_v42 = vpop.f32.mrf.mxu1  ;;  %1298 = vmatpush.msrb.mxu1 %v2007_v39 }
 0x1e3   : > { %v658_v43 = vadd.f32 %v2425_v17, %v657_v42  ;;  %994 = vmatmul.f32.gmra.mxu3 %v917_v40 }
 0x1e4   : > { %v802_v44 = vpop.f32.mrf.mxu2 }
 0x1e5   : > { %v803_v45 = vadd.f32 %v2534_v49, %v802_v44  ;;  %v707_v46 = vmul.f32 0.01, %v658_v43 }
 0x1e7   : > { %v739_v47 = vmax.f32 %v658_v43, %v707_v46  ;;  %v886_v48 = vmul.f32 0.01, %v803_v45 }
 0x1e9   : > { %852 = vmatmul.f32.gmra.mxu2 %v739_v47  ;;  %v918_v51 = vmax.f32 %v803_v45, %v886_v48 }
 0x1ea   : > { %v660_v52 = vpop.f32.mrf.mxu1 }
 0x1eb   : > { %v661_v53 = vadd.f32 %v2425_v17, %v660_v52  ;;  %997 = vmatmul.f32.gmra.mxu3 %v918_v51 }
 0x1ec   : > { %v805_v54 = vpop.f32.mrf.mxu2 }
 0x1ed   : > { %v708_v55 = vmul.f32 0.01, %v661_v53  ;;  %v806_v56 = vadd.f32 %v2534_v49, %v805_v54 }
 0x1ef   : > { %v740_v57 = vmax.f32 %v661_v53, %v708_v55  ;;  %v887_v58 = vmul.f32 0.01, %v806_v56 }
 0x1f1   : > { %855 = vmatmul.f32.gmra.mxu2 %v740_v57  ;;  %v919_v59 = vmax.f32 %v806_v56, %v887_v58  ;;  %v2006_v57 = vld [vmem:[%s2959_s2 + $0x238] sm:$0xff] }
 0x1f2   : > { %v663_v61 = vpop.f32.mrf.mxu1  ;;  %1299 = vmatpush.msrb.mxu1 %v2006_v57 }
 0x1f3   : > { %v664_v62 = vadd.f32 %v2425_v17, %v663_v61  ;;  %1000 = vmatmul.f32.gmra.mxu3 %v919_v59  ;;  %v2030_v61 = vld [vmem:[%s2959_s2 + $0x2f8] sm:$0xff] }
 0x1f4   : > { %v808_v63 = vpop.f32.mrf.mxu2  ;;  %1487 = vmatpush.msrb.mxu2 %v2030_v61 }
 0x1f5   : > { %v709_v0 = vmul.f32 0.01, %v664_v62  ;;  %v809_v1 = vadd.f32 %v2534_v49, %v808_v63 }
 0x1f7   : > { %v741_v2 = vmax.f32 %v664_v62, %v709_v0  ;;  %v888_v3 = vmul.f32 0.01, %v809_v1 }
 0x1f9   : > { %858 = vmatmul.f32.gmra.mxu2 %v741_v2  ;;  %v920_v5 = vmax.f32 %v809_v1, %v888_v3  ;;  %v2005_v3 = vld [vmem:[%s2959_s2 + $0x230] sm:$0xff] }
 0x1fa   : > { %v666_v6 = vpop.f32.mrf.mxu1  ;;  %1300 = vmatpush.msrb.mxu1 %v2005_v3 }
 0x1fb   : > { %v667_v7 = vadd.f32 %v2425_v17, %v666_v6  ;;  %1003 = vmatmul.f32.gmra.mxu3 %v920_v5  ;;  %v2029_v6 = vld [vmem:[%s2959_s2 + $0x2f0] sm:$0xff] }
 0x1fc   : > { %v811_v8 = vpop.f32.mrf.mxu2  ;;  %1488 = vmatpush.msrb.mxu2 %v2029_v6 }
 0x1fd   : > { %v710_v9 = vmul.f32 0.01, %v667_v7  ;;  %v812_v10 = vadd.f32 %v2534_v49, %v811_v8 }
 0x1ff   : > { %v742_v11 = vmax.f32 %v667_v7, %v710_v9  ;;  %v889_v12 = vmul.f32 0.01, %v812_v10  ;;  %v2622_v7 = vld [vmem:[#allocation4 + $0x3] ss:$0 sm:$0xff] }
 0x201   : > { %861 = vmatmul.f32.gmra.mxu2 %v742_v11  ;;  %v921_v13 = vmax.f32 %v812_v10, %v889_v12 }
 0x202   : > { %v669_v15 = vpop.f32.mrf.mxu1 }
 0x203   : > { %v670_v16 = vadd.f32 %v2425_v17, %v669_v15  ;;  %1006 = vmatmul.f32.gmra.mxu3 %v921_v13 }
 0x204   : > { %v814_v18 = vpop.f32.mrf.mxu2 }
 0x205   : > { %v711_v19 = vmul.f32 0.01, %v670_v16  ;;  %v815_v20 = vadd.f32 %v2534_v49, %v814_v18 }
 0x207   : > { %v743_v21 = vmax.f32 %v670_v16, %v711_v19  ;;  %v890_v22 = vmul.f32 0.01, %v815_v20  ;;  %v2004_v16 = vld [vmem:[%s2959_s2 + $0x228] sm:$0xff] }
 0x208   : > { %1301 = vmatpush.msrb.mxu1 %v2004_v16 }
 0x209   : > { %864 = vmatmul.f32.gmra.mxu2 %v743_v21  ;;  %v922_v24 = vmax.f32 %v815_v20, %v890_v22  ;;  %v2028_v22 = vld [vmem:[%s2959_s2 + $0x2e8] sm:$0xff] }
 0x20a   : > { %v672_v25 = vpop.f32.mrf.mxu1  ;;  %1489 = vmatpush.msrb.mxu2 %v2028_v22 }
 0x20b   : > { %v673_v26 = vadd.f32 %v2425_v17, %v672_v25  ;;  %1009 = vmatmul.f32.gmra.mxu3 %v922_v24 }
 0x20c   : > { %v817_v27 = vpop.f32.mrf.mxu2 }
 0x20d   : > { %v712_v28 = vmul.f32 0.01, %v673_v26  ;;  %v818_v29 = vadd.f32 %v2534_v49, %v817_v27 }
 0x20f   : > { %v744_v31 = vmax.f32 %v673_v26, %v712_v28  ;;  %v891_v32 = vmul.f32 0.01, %v818_v29 }
 0x211   : > { %867 = vmatmul.f32.gmra.mxu2 %v744_v31  ;;  %v923_v33 = vmax.f32 %v818_v29, %v891_v32 }
 0x212   : > { %v675_v34 = vpop.f32.mrf.mxu1 }
 0x213   : > { %v676_v35 = vadd.f32 %v2425_v17, %v675_v34  ;;  %1012 = vmatmul.f32.gmra.mxu3 %v923_v33 }
 0x214   : > { %v820_v36 = vpop.f32.mrf.mxu2 }
 0x215   : > { %v713_v37 = vmul.f32 0.01, %v676_v35  ;;  %v821_v38 = vadd.f32 %v2534_v49, %v820_v36  ;;  %v2027_v36 = vld [vmem:[%s2959_s2 + $0x2e0] sm:$0xff] }
 0x216   : > { %1490 = vmatpush.msrb.mxu2 %v2027_v36 }
 0x217   : > { %v745_v40 = vmax.f32 %v676_v35, %v713_v37  ;;  %v892_v41 = vmul.f32 0.01, %v821_v38  ;;  %v2003_v35 = vld [vmem:[%s2959_s2 + $0x220] sm:$0xff] }
 0x218   : > { %1302 = vmatpush.msrb.mxu1 %v2003_v35 }
 0x219   : > { %870 = vmatmul.f32.gmra.mxu2 %v745_v40  ;;  %v924_v42 = vmax.f32 %v821_v38, %v892_v41 }
 0x21a   : > { %v678_v43 = vpop.f32.mrf.mxu1 }
 0x21b   : > { %v679_v44 = vadd.f32 %v2425_v17, %v678_v43  ;;  %1015 = vmatmul.f32.gmra.mxu3 %v924_v42 }
 0x21c   : > { %v823_v45 = vpop.f32.mrf.mxu2 }
 0x21d   : > { %v714_v46 = vmul.f32 0.01, %v679_v44  ;;  %v824_v47 = vadd.f32 %v2534_v49, %v823_v45 }
 0x21f   : > { %v746_v48 = vmax.f32 %v679_v44, %v714_v46  ;;  %v893_v50 = vmul.f32 0.01, %v824_v47 }
 0x221   : > { %873 = vmatmul.f32.gmra.mxu2 %v746_v48  ;;  %v925_v51 = vmax.f32 %v824_v47, %v893_v50  ;;  %v2002_v50 = vld [vmem:[%s2959_s2 + $0x218] sm:$0xff] }
 0x222   : > { %v681_v52 = vpop.f32.mrf.mxu1  ;;  %1303 = vmatpush.msrb.mxu1 %v2002_v50 }
 0x223   : > { %v682_v53 = vadd.f32 %v2425_v17, %v681_v52  ;;  %1018 = vmatmul.f32.gmra.mxu3 %v925_v51  ;;  %v2026_v51 = vld [vmem:[%s2959_s2 + $0x2d8] sm:$0xff] }
 0x224   : > { %v826_v54 = vpop.f32.mrf.mxu2  ;;  %1491 = vmatpush.msrb.mxu2 %v2026_v51  ;;  %v2046_v51 = vld [vmem:[%s2959_s2 + $0x378] sm:$0xff] }
 0x225   : > { %v715_v55 = vmul.f32 0.01, %v682_v53  ;;  %v827_v56 = vadd.f32 %v2534_v49, %v826_v54  ;;  %1683 = vmatpush.msrb.mxu3 %v2046_v51 }
 0x227   : > { %v747_v58 = vmax.f32 %v682_v53, %v715_v55  ;;  %v894_v59 = vmul.f32 0.01, %v827_v56 }
 0x229   : > { %876 = vmatmul.f32.gmra.mxu2 %v747_v58  ;;  %v926_v60 = vmax.f32 %v827_v56, %v894_v59 }
 0x22b   : > { %1021 = vmatmul.f32.gmra.mxu3 %v926_v60 }
 0x22c   : > { %v829_v17 = vpop.f32.mrf.mxu2 }
 0x22d   : > { %v830_v62 = vadd.f32 %v2534_v49, %v829_v17 }
 0x22f   : > { %v895_v63 = vmul.f32 0.01, %v830_v62 }
 0x231   : > { %v927_v0 = vmax.f32 %v830_v62, %v895_v63  ;;  %v2001_v63 = vld [vmem:[%s2959_s2 + $0x210] sm:$0xff] }
 0x232   : > { %1304 = vmatpush.msrb.mxu1 %v2001_v63 }
 0x233   : > { %1024 = vmatmul.f32.gmra.mxu3 %v927_v0  ;;  %v2025_v0 = vld [vmem:[%s2959_s2 + $0x2d0] sm:$0xff] }
 0x234   : > { %v832_v1 = vpop.f32.mrf.mxu2  ;;  %1492 = vmatpush.msrb.mxu2 %v2025_v0 }
 0x235   : > { %v833_v2 = vadd.f32 %v2534_v49, %v832_v1 }
 0x237   : > { %v896_v4 = vmul.f32 0.01, %v833_v2 }
 0x239   : > { %v928_v5 = vmax.f32 %v833_v2, %v896_v4 }
 0x23b   : > { %1027 = vmatmul.f32.gmra.mxu3 %v928_v5 }
 0x23c   : > { %v835_v8 = vpop.f32.mrf.mxu2 }
 0x23d   : > { %v836_v9 = vadd.f32 %v2534_v49, %v835_v8 }
 0x23e   : > { %v980_v10 = vpop.f32.mrf.mxu3 }
 0x23f   : > { %v981_v11 = vadd.f32 %v2622_v7, %v980_v10  ;;  %v897_v12 = vmul.f32 0.01, %v836_v9 }
 0x241   : > { %1111 = vmatmul.f32.vlgmr.msrb.gmra.mxu0 %v981_v11  ;;  %v929_v13 = vmax.f32 %v836_v9, %v897_v12 }
 0x243   : > { %1030 = vmatmul.f32.gmra.mxu3 %v929_v13 }
 0x244   : > { %v838_v14 = vpop.f32.mrf.mxu2 }
 0x245   : > { %v839_v15 = vadd.f32 %v2534_v49, %v838_v14  ;;  %v2000_v14 = vld [vmem:[%s2959_s2 + $0x208] sm:$0xff] }
 0x246   : > { %v983_v18 = vpop.f32.mrf.mxu3  ;;  %1305 = vmatpush.msrb.mxu1 %v2000_v14 }
 0x247   : > { %v984_v19 = vadd.f32 %v2622_v7, %v983_v18  ;;  %v898_v20 = vmul.f32 0.01, %v839_v15 }
 0x249   : > { %1114 = vmatmul.f32.gmra.mxu0 %v984_v19  ;;  %v930_v21 = vmax.f32 %v839_v15, %v898_v20  ;;  %v2024_v15 = vld [vmem:[%s2959_s2 + $0x2c8] sm:$0xff] }
 0x24a   : > { %1493 = vmatpush.msrb.mxu2 %v2024_v15 }
 0x24b   : > { %1033 = vmatmul.f32.gmra.mxu3 %v930_v21 }
 0x24c   : > { %v841_v23 = vpop.f32.mrf.mxu2 }
 0x24d   : > { %v842_v24 = vadd.f32 %v2534_v49, %v841_v23  ;;  %v1999_v23 = vld [vmem:[%s2959_s2 + $0x200] sm:$0xff] }
 0x24e   : > { %v986_v25 = vpop.f32.mrf.mxu3  ;;  %1306 = vmatpush.msrb.mxu1 %v1999_v23 }
 0x24f   : > { %v987_v26 = vadd.f32 %v2622_v7, %v986_v25  ;;  %v899_v27 = vmul.f32 0.01, %v842_v24 }
 0x251   : > { %1117 = vmatmul.f32.gmra.mxu0 %v987_v26  ;;  %v931_v28 = vmax.f32 %v842_v24, %v899_v27 }
 0x253   : > { %1036 = vmatmul.f32.gmra.mxu3 %v931_v28 }
 0x254   : > { %v844_v29 = vpop.f32.mrf.mxu2 }
 0x255   : > { %v845_v30 = vadd.f32 %v2534_v49, %v844_v29 }
 0x256   : > { %v989_v31 = vpop.f32.mrf.mxu3 }
 0x257   : > { %v990_v32 = vadd.f32 %v2622_v7, %v989_v31  ;;  %v900_v33 = vmul.f32 0.01, %v845_v30 }
 0x259   : > { %1120 = vmatmul.f32.gmra.mxu0 %v990_v32  ;;  %v932_v34 = vmax.f32 %v845_v30, %v900_v33  ;;  %v2023_v30 = vld [vmem:[%s2959_s2 + $0x2c0] sm:$0xff] }
 0x25a   : > { %1494 = vmatpush.msrb.mxu2 %v2023_v30 }
 0x25b   : > { %1039 = vmatmul.f32.gmra.mxu3 %v932_v34 }
 0x25c   : > { %v847_v37 = vpop.f32.mrf.mxu2 }
 0x25d   : > { %v848_v38 = vadd.f32 %v2534_v49, %v847_v37 }
 0x25e   : > { %v992_v39 = vpop.f32.mrf.mxu3 }
 0x25f   : > { %v993_v40 = vadd.f32 %v2622_v7, %v992_v39  ;;  %v901_v41 = vmul.f32 0.01, %v848_v38 }
 0x261   : > { %1123 = vmatmul.f32.gmra.mxu0 %v993_v40  ;;  %v933_v42 = vmax.f32 %v848_v38, %v901_v41 }
 0x263   : > { %1042 = vmatmul.f32.gmra.mxu3 %v933_v42 }
 0x264   : > { %v850_v43 = vpop.f32.mrf.mxu2 }
 0x265   : > { %v851_v44 = vadd.f32 %v2534_v49, %v850_v43  ;;  %v2022_v43 = vld [vmem:[%s2959_s2 + $0x2b8] sm:$0xff] }
 0x266   : > { %v995_v45 = vpop.f32.mrf.mxu3  ;;  %1495 = vmatpush.msrb.mxu2 %v2022_v43 }
 0x267   : > { %v996_v46 = vadd.f32 %v2622_v7, %v995_v45  ;;  %v902_v47 = vmul.f32 0.01, %v851_v44 }
 0x269   : > { %1126 = vmatmul.f32.gmra.mxu0 %v996_v46  ;;  %v934_v48 = vmax.f32 %v851_v44, %v902_v47 }
 0x26b   : > { %1045 = vmatmul.f32.gmra.mxu3 %v934_v48 }
 0x26c   : > { %v853_v52 = vpop.f32.mrf.mxu2 }
 0x26d   : > { %v854_v53 = vadd.f32 %v2534_v49, %v853_v52 }
 0x26e   : > { %v998_v54 = vpop.f32.mrf.mxu3 }
 0x26f   : > { %v999_v55 = vadd.f32 %v2622_v7, %v998_v54  ;;  %v903_v56 = vmul.f32 0.01, %v854_v53  ;;  %v2697_v54 = vld [vmem:[#allocation4 + $0x4] ss:$0 sm:$0xff] }
 0x271   : > { %1129 = vmatmul.f32.gmra.mxu0 %v999_v55  ;;  %v935_v57 = vmax.f32 %v854_v53, %v903_v56 }
 0x273   : > { %1048 = vmatmul.f32.gmra.mxu3 %v935_v57 }
 0x274   : > { %v856_v58 = vpop.f32.mrf.mxu2 }
 0x275   : > { %v857_v59 = vadd.f32 %v2534_v49, %v856_v58 }
 0x276   : > { %v1001_v60 = vpop.f32.mrf.mxu3 }
 0x277   : > { %v904_v61 = vmul.f32 0.01, %v857_v59  ;;  %v1002_v17 = vadd.f32 %v2622_v7, %v1001_v60 }
 0x279   : > { %v936_v62 = vmax.f32 %v857_v59, %v904_v61  ;;  %1132 = vmatmul.f32.gmra.mxu0 %v1002_v17  ;;  %v2045_v61 = vld [vmem:[%s2959_s2 + $0x370] sm:$0xff] }
 0x27a   : > { %1684 = vmatpush.msrb.mxu3 %v2045_v61 }
 0x27b   : > { %1051 = vmatmul.f32.gmra.mxu3 %v936_v62 }
 0x27c   : > { %v859_v1 = vpop.f32.mrf.mxu2 }
 0x27d   : > { %v860_v2 = vadd.f32 %v2534_v49, %v859_v1 }
 0x27e   : > { %v1004_v3 = vpop.f32.mrf.mxu3 }
 0x27f   : > { %v905_v4 = vmul.f32 0.01, %v860_v2  ;;  %v1005_v5 = vadd.f32 %v2622_v7, %v1004_v3  ;;  %v2020_v3 = vld [vmem:[%s2959_s2 + $0x2a8] sm:$0xff] }
 0x281   : > { %v937_v6 = vmax.f32 %v860_v2, %v905_v4  ;;  %1135 = vmatmul.f32.gmra.mxu0 %v1005_v5 }
 0x283   : > { %1054 = vmatmul.f32.gmra.mxu3 %v937_v6 }
 0x284   : > { %v862_v8 = vpop.f32.mrf.mxu2 }
 0x285   : > { %v863_v9 = vadd.f32 %v2534_v49, %v862_v8 }
 0x286   : > { %v1007_v10 = vpop.f32.mrf.mxu3 }
 0x287   : > { %v906_v11 = vmul.f32 0.01, %v863_v9  ;;  %v1008_v12 = vadd.f32 %v2622_v7, %v1007_v10 }
 0x289   : > { %v938_v13 = vmax.f32 %v863_v9, %v906_v11  ;;  %1138 = vmatmul.f32.gmra.mxu0 %v1008_v12  ;;  %v2044_v11 = vld [vmem:[%s2959_s2 + $0x368] sm:$0xff] }
 0x28a   : > { %1685 = vmatpush.msrb.mxu3 %v2044_v11 }
 0x28b   : > { %1057 = vmatmul.f32.gmra.mxu3 %v938_v13 }
 0x28c   : > { %v865_v16 = vpop.f32.mrf.mxu2 }
 0x28d   : > { %v866_v18 = vadd.f32 %v2534_v49, %v865_v16 }
 0x28e   : > { %v1010_v19 = vpop.f32.mrf.mxu3 }
 0x28f   : > { %v907_v20 = vmul.f32 0.01, %v866_v18  ;;  %v1011_v21 = vadd.f32 %v2622_v7, %v1010_v19  ;;  %v2019_v19 = vld [vmem:[%s2959_s2 + $0x2a0] sm:$0xff] }
 0x291   : > { %v939_v22 = vmax.f32 %v866_v18, %v907_v20  ;;  %1141 = vmatmul.f32.gmra.mxu0 %v1011_v21 }
 0x293   : > { %1060 = vmatmul.f32.gmra.mxu3 %v939_v22 }
 0x294   : > { %v868_v24 = vpop.f32.mrf.mxu2 }
 0x295   : > { %v869_v25 = vadd.f32 %v2534_v49, %v868_v24 }
 0x296   : > { %v1013_v26 = vpop.f32.mrf.mxu3 }
 0x297   : > { %v908_v27 = vmul.f32 0.01, %v869_v25  ;;  %v1014_v28 = vadd.f32 %v2622_v7, %v1013_v26  ;;  %v2043_v26 = vld [vmem:[%s2959_s2 + $0x360] sm:$0xff] }
 0x298   : > { %1686 = vmatpush.msrb.mxu3 %v2043_v26 }
 0x299   : > { %v940_v29 = vmax.f32 %v869_v25, %v908_v27  ;;  %1144 = vmatmul.f32.gmra.mxu0 %v1014_v28 }
 0x29b   : > { %1063 = vmatmul.f32.gmra.mxu3 %v940_v29 }
 0x29c   : > { %v871_v31 = vpop.f32.mrf.mxu2 }
 0x29d   : > { %v872_v32 = vadd.f32 %v2534_v49, %v871_v31 }
 0x29e   : > { %v1016_v33 = vpop.f32.mrf.mxu3 }
 0x29f   : > { %v909_v34 = vmul.f32 0.01, %v872_v32  ;;  %v1017_v35 = vadd.f32 %v2622_v7, %v1016_v33  ;;  %v2018_v33 = vld [vmem:[%s2959_s2 + $0x298] sm:$0xff] }
 0x2a1   : > { %v941_v36 = vmax.f32 %v872_v32, %v909_v34  ;;  %1147 = vmatmul.f32.gmra.mxu0 %v1017_v35 }
 0x2a3   : > { %1066 = vmatmul.f32.gmra.mxu3 %v941_v36 }
 0x2a4   : > { %v874_v37 = vpop.f32.mrf.mxu2 }
 0x2a5   : > { %v875_v38 = vadd.f32 %v2534_v49, %v874_v37 }
 0x2a6   : > { %v1019_v39 = vpop.f32.mrf.mxu3 }
 0x2a7   : > { %v910_v40 = vmul.f32 0.01, %v875_v38  ;;  %v1020_v41 = vadd.f32 %v2622_v7, %v1019_v39 }
 0x2a9   : > { %v942_v42 = vmax.f32 %v875_v38, %v910_v40  ;;  %1150 = vmatmul.f32.gmra.mxu0 %v1020_v41  ;;  %v2042_v40 = vld [vmem:[%s2959_s2 + $0x358] sm:$0xff] }
 0x2aa   : > { %1687 = vmatpush.msrb.mxu3 %v2042_v40 }
 0x2ab   : > { %1069 = vmatmul.f32.gmra.mxu3 %v942_v42 }
 0x2ac   : > { %v877_v44 = vpop.f32.mrf.mxu2 }
 0x2ad   : > { %v878_v45 = vadd.f32 %v2534_v49, %v877_v44  ;;  %v2021_v49 = vld [vmem:[%s2959_s2 + $0x2b0] sm:$0xff] }
 0x2ae   : > { %v1022_v46 = vpop.f32.mrf.mxu3  ;;  %1496 = vmatpush.msrb.mxu2 %v2021_v49 }
 0x2af   : > { %v911_v47 = vmul.f32 0.01, %v878_v45  ;;  %v1023_v48 = vadd.f32 %v2622_v7, %v1022_v46 }
 0x2b0   : > { %1497 = vmatpush.msrb.mxu2 %v2020_v3 }
 0x2b1   : > { %v943_v50 = vmax.f32 %v878_v45, %v911_v47  ;;  %1153 = vmatmul.f32.gmra.mxu0 %v1023_v48  ;;  %v2017_v47 = vld [vmem:[%s2959_s2 + $0x290] sm:$0xff] }
 0x2b2   : > { %1498 = vmatpush.msrb.mxu2 %v2019_v19 }
 0x2b3   : > { %1072 = vmatmul.f32.gmra.mxu3 %v943_v50 }
 0x2b4   : > { %1499 = vmatpush.msrb.mxu2 %v2018_v33 }
 0x2b6   : > { %v1025_v52 = vpop.f32.mrf.mxu3  ;;  %1500 = vmatpush.msrb.mxu2 %v2017_v47 }
 0x2b7   : > { %v1026_v53 = vadd.f32 %v2622_v7, %v1025_v52 }
 0x2b9   : > { %1156 = vmatmul.f32.gmra.mxu0 %v1026_v53 }
 0x2be   : > { %v1028_v55 = vpop.f32.mrf.mxu3  ;;  %v1112_v56 = vpop.f32.mrf.mxu0 }
 0x2bf   : > { %v1029_v57 = vadd.f32 %v2622_v7, %v1028_v55  ;;  %v1113_v58 = vadd.f32 %v2697_v54, %v1112_v56  ;;  %v2041_v55 = vld [vmem:[%s2959_s2 + $0x350] sm:$0xff] }
 0x2c0   : > { %1688 = vmatpush.msrb.mxu3 %v2041_v55 }
 0x2c1   : > { %v1208_v59 = vmul.f32 0.01, %v1113_v58  ;;  %1159 = vmatmul.f32.gmra.mxu0 %v1029_v57 }
 0x2c3   : > { %v1240_v60 = vmax.f32 %v1113_v58, %v1208_v59 }
 0x2c5   : > { %1307 = vmatmul.f32.vlgmr.msrb.gmra.mxu1 %v1240_v60 }
 0x2c6   : > { %v1031_v17 = vpop.f32.mrf.mxu3  ;;  %v1115_v62 = vpop.f32.mrf.mxu0 }
 0x2c7   : > { %v1032_v63 = vadd.f32 %v2622_v7, %v1031_v17  ;;  %v1116_v0 = vadd.f32 %v2697_v54, %v1115_v62  ;;  %v2016_v17 = vld [vmem:[%s2959_s2 + $0x288] sm:$0xff] }
 0x2c8   : > { %1501 = vmatpush.msrb.mxu2 %v2016_v17 }
 0x2c9   : > { %v1209_v1 = vmul.f32 0.01, %v1116_v0  ;;  %1162 = vmatmul.f32.gmra.mxu0 %v1032_v63 }
 0x2cb   : > { %v1241_v2 = vmax.f32 %v1116_v0, %v1209_v1 }
 0x2cd   : > { %1310 = vmatmul.f32.gmra.mxu1 %v1241_v2 }
 0x2ce   : > { %v1034_v4 = vpop.f32.mrf.mxu3  ;;  %v1118_v5 = vpop.f32.mrf.mxu0 }
 0x2cf   : > { %v1035_v6 = vadd.f32 %v2622_v7, %v1034_v4  ;;  %v1119_v8 = vadd.f32 %v2697_v54, %v1118_v5  ;;  %v2040_v4 = vld [vmem:[%s2959_s2 + $0x348] sm:$0xff] }
 0x2d0   : > { %1689 = vmatpush.msrb.mxu3 %v2040_v4 }
 0x2d1   : > { %v1210_v9 = vmul.f32 0.01, %v1119_v8  ;;  %1165 = vmatmul.f32.gmra.mxu0 %v1035_v6 }
 0x2d3   : > { %v1242_v10 = vmax.f32 %v1119_v8, %v1210_v9 }
 0x2d5   : > { %1313 = vmatmul.f32.gmra.mxu1 %v1242_v10 }
 0x2d6   : > { %v1037_v12 = vpop.f32.mrf.mxu3  ;;  %v1121_v13 = vpop.f32.mrf.mxu0 }
 0x2d7   : > { %v1038_v14 = vadd.f32 %v2622_v7, %v1037_v12  ;;  %v1122_v15 = vadd.f32 %v2697_v54, %v1121_v13  ;;  %v2015_v12 = vld [vmem:[%s2959_s2 + $0x280] sm:$0xff] }
 0x2d8   : > { %1502 = vmatpush.msrb.mxu2 %v2015_v12 }
 0x2d9   : > { %v1211_v16 = vmul.f32 0.01, %v1122_v15  ;;  %1168 = vmatmul.f32.gmra.mxu0 %v1038_v14 }
 0x2db   : > { %v1243_v18 = vmax.f32 %v1122_v15, %v1211_v16 }
 0x2dd   : > { %1316 = vmatmul.f32.gmra.mxu1 %v1243_v18 }
 0x2de   : > { %v1040_v20 = vpop.f32.mrf.mxu3  ;;  %v1124_v21 = vpop.f32.mrf.mxu0 }
 0x2df   : > { %v1041_v22 = vadd.f32 %v2622_v7, %v1040_v20  ;;  %v1125_v23 = vadd.f32 %v2697_v54, %v1124_v21 }
 0x2e1   : > { %v1212_v24 = vmul.f32 0.01, %v1125_v23  ;;  %1171 = vmatmul.f32.gmra.mxu0 %v1041_v22 }
 0x2e3   : > { %v1244_v25 = vmax.f32 %v1125_v23, %v1212_v24  ;;  %v2039_v24 = vld [vmem:[%s2959_s2 + $0x340] sm:$0xff] }
 0x2e4   : > { %1690 = vmatpush.msrb.mxu3 %v2039_v24 }
 0x2e5   : > { %1319 = vmatmul.f32.gmra.mxu1 %v1244_v25 }
 0x2e6   : > { %v1043_v27 = vpop.f32.mrf.mxu3  ;;  %v1127_v28 = vpop.f32.mrf.mxu0 }
 0x2e7   : > { %v1044_v29 = vadd.f32 %v2622_v7, %v1043_v27  ;;  %v1128_v30 = vadd.f32 %v2697_v54, %v1127_v28 }
 0x2e9   : > { %v1213_v31 = vmul.f32 0.01, %v1128_v30  ;;  %1174 = vmatmul.f32.gmra.mxu0 %v1044_v29 }
 0x2eb   : > { %v1245_v32 = vmax.f32 %v1128_v30, %v1213_v31 }
 0x2ed   : > { %1322 = vmatmul.f32.gmra.mxu1 %v1245_v32 }
 0x2ee   : > { %v1046_v34 = vpop.f32.mrf.mxu3  ;;  %v1130_v35 = vpop.f32.mrf.mxu0 }
 0x2ef   : > { %v1047_v36 = vadd.f32 %v2622_v7, %v1046_v34  ;;  %v1131_v37 = vadd.f32 %v2697_v54, %v1130_v35 }
 0x2f1   : > { %v1214_v38 = vmul.f32 0.01, %v1131_v37  ;;  %1177 = vmatmul.f32.gmra.mxu0 %v1047_v36 }
 0x2f3   : > { %v1246_v39 = vmax.f32 %v1131_v37, %v1214_v38  ;;  %v2038_v37 = vld [vmem:[%s2959_s2 + $0x338] sm:$0xff] }
 0x2f4   : > { %1691 = vmatpush.msrb.mxu3 %v2038_v37 }
 0x2f5   : > { %1325 = vmatmul.f32.gmra.mxu1 %v1246_v39 }
 0x2f6   : > { %v1049_v41 = vpop.f32.mrf.mxu3  ;;  %v1133_v42 = vpop.f32.mrf.mxu0 }
 0x2f7   : > { %v1050_v43 = vadd.f32 %v2622_v7, %v1049_v41  ;;  %v1134_v44 = vadd.f32 %v2697_v54, %v1133_v42  ;;  %v2777_v42 = vld [vmem:[#allocation4 + $0x5] ss:$0 sm:$0xff] }
 0x2f9   : > { %v1215_v45 = vmul.f32 0.01, %v1134_v44  ;;  %1180 = vmatmul.f32.gmra.mxu0 %v1050_v43 }
 0x2fb   : > { %v1247_v46 = vmax.f32 %v1134_v44, %v1215_v45 }
 0x2fd   : > { %1328 = vmatmul.f32.gmra.mxu1 %v1247_v46 }
 0x2fe   : > { %v1052_v48 = vpop.f32.mrf.mxu3  ;;  %v1136_v50 = vpop.f32.mrf.mxu0 }
 0x2ff   : > { %v1053_v51 = vadd.f32 %v2622_v7, %v1052_v48  ;;  %v1137_v52 = vadd.f32 %v2697_v54, %v1136_v50 }
 0x301   : > { %v1216_v53 = vmul.f32 0.01, %v1137_v52  ;;  %1183 = vmatmul.f32.gmra.mxu0 %v1053_v51  ;;  %v2037_v51 = vld [vmem:[%s2959_s2 + $0x330] sm:$0xff] }
 0x302   : > { %1692 = vmatpush.msrb.mxu3 %v2037_v51 }
 0x303   : > { %v1248_v49 = vmax.f32 %v1137_v52, %v1216_v53 }
 0x305   : > { %1331 = vmatmul.f32.gmra.mxu1 %v1248_v49 }
 0x306   : > { %v1055_v56 = vpop.f32.mrf.mxu3  ;;  %v1139_v57 = vpop.f32.mrf.mxu0 }
 0x307   : > { %v1056_v58 = vadd.f32 %v2622_v7, %v1055_v56  ;;  %v1140_v59 = vadd.f32 %v2697_v54, %v1139_v57 }
 0x309   : > { %v1217_v60 = vmul.f32 0.01, %v1140_v59  ;;  %1186 = vmatmul.f32.gmra.mxu0 %v1056_v58 }
 0x30b   : > { %v1249_v61 = vmax.f32 %v1140_v59, %v1217_v60 }
 0x30d   : > { %1334 = vmatmul.f32.gmra.mxu1 %v1249_v61 }
 0x30e   : > { %v1058_v62 = vpop.f32.mrf.mxu3  ;;  %v1142_v63 = vpop.f32.mrf.mxu0 }
 0x30f   : > { %v1059_v0 = vadd.f32 %v2622_v7, %v1058_v62  ;;  %v1143_v1 = vadd.f32 %v2697_v54, %v1142_v63 }
 0x311   : > { %v1218_v2 = vmul.f32 0.01, %v1143_v1  ;;  %1189 = vmatmul.f32.gmra.mxu0 %v1059_v0 }
 0x313   : > { %v1250_v3 = vmax.f32 %v1143_v1, %v1218_v2 }
 0x315   : > { %1337 = vmatmul.f32.gmra.mxu1 %v1250_v3  ;;  %v2036_v3 = vld [vmem:[%s2959_s2 + $0x328] sm:$0xff] }
 0x316   : > { %v1061_v5 = vpop.f32.mrf.mxu3  ;;  %v1145_v6 = vpop.f32.mrf.mxu0  ;;  %1693 = vmatpush.msrb.mxu3 %v2036_v3 }
 0x317   : > { %v1062_v8 = vadd.f32 %v2622_v7, %v1061_v5  ;;  %v1146_v9 = vadd.f32 %v2697_v54, %v1145_v6 }
 0x319   : > { %v1219_v10 = vmul.f32 0.01, %v1146_v9  ;;  %1192 = vmatmul.f32.gmra.mxu0 %v1062_v8 }
 0x31b   : > { %v1251_v11 = vmax.f32 %v1146_v9, %v1219_v10 }
 0x31d   : > { %1340 = vmatmul.f32.gmra.mxu1 %v1251_v11 }
 0x31e   : > { %v1064_v13 = vpop.f32.mrf.mxu3  ;;  %v1148_v14 = vpop.f32.mrf.mxu0 }
 0x31f   : > { %v1065_v15 = vadd.f32 %v2622_v7, %v1064_v13  ;;  %v1149_v16 = vadd.f32 %v2697_v54, %v1148_v14 }
 0x321   : > { %v1220_v18 = vmul.f32 0.01, %v1149_v16  ;;  %1195 = vmatmul.f32.gmra.mxu0 %v1065_v15 }
 0x323   : > { %v1252_v19 = vmax.f32 %v1149_v16, %v1220_v18 }
 0x325   : > { %1343 = vmatmul.f32.gmra.mxu1 %v1252_v19 }
 0x326   : > { %v1067_v20 = vpop.f32.mrf.mxu3  ;;  %v1151_v21 = vpop.f32.mrf.mxu0 }
 0x327   : > { %v1068_v22 = vadd.f32 %v2622_v7, %v1067_v20  ;;  %v1152_v23 = vadd.f32 %v2697_v54, %v1151_v21 }
 0x329   : > { %v1221_v25 = vmul.f32 0.01, %v1152_v23  ;;  %1198 = vmatmul.f32.gmra.mxu0 %v1068_v22  ;;  %v2035_v22 = vld [vmem:[%s2959_s2 + $0x320] sm:$0xff] }
 0x32a   : > { %1694 = vmatpush.msrb.mxu3 %v2035_v22 }
 0x32b   : > { %v1253_v26 = vmax.f32 %v1152_v23, %v1221_v25 }
 0x32d   : > { %1346 = vmatmul.f32.gmra.mxu1 %v1253_v26 }
 0x32e   : > { %v1070_v27 = vpop.f32.mrf.mxu3  ;;  %v1154_v28 = vpop.f32.mrf.mxu0 }
 0x32f   : > { %v1071_v29 = vadd.f32 %v2622_v7, %v1070_v27  ;;  %v1155_v30 = vadd.f32 %v2697_v54, %v1154_v28 }
 0x331   : > { %v1222_v31 = vmul.f32 0.01, %v1155_v30  ;;  %1201 = vmatmul.f32.gmra.mxu0 %v1071_v29 }
 0x333   : > { %v1254_v32 = vmax.f32 %v1155_v30, %v1222_v31 }
 0x335   : > { %1349 = vmatmul.f32.gmra.mxu1 %v1254_v32 }
 0x336   : > { %v1073_v33 = vpop.f32.mrf.mxu3  ;;  %v1157_v34 = vpop.f32.mrf.mxu0 }
 0x337   : > { %v1074_v35 = vadd.f32 %v2622_v7, %v1073_v33  ;;  %v1158_v36 = vadd.f32 %v2697_v54, %v1157_v34 }
 0x339   : > { %v1223_v38 = vmul.f32 0.01, %v1158_v36  ;;  %1204 = vmatmul.f32.gmra.mxu0 %v1074_v35 }
 0x33b   : > { %v1255_v39 = vmax.f32 %v1158_v36, %v1223_v38 }
 0x33d   : > { %1352 = vmatmul.f32.gmra.mxu1 %v1255_v39  ;;  %v2034_v39 = vld [vmem:[%s2959_s2 + $0x318] sm:$0xff] }
 0x33e   : > { %v1160_v40 = vpop.f32.mrf.mxu0  ;;  %1695 = vmatpush.msrb.mxu3 %v2034_v39 }
 0x33f   : > { %v1161_v41 = vadd.f32 %v2697_v54, %v1160_v40 }
 0x341   : > { %v1224_v43 = vmul.f32 0.01, %v1161_v41 }
 0x342   : > { %v1308_v44 = vpop.f32.mrf.mxu1 }
 0x343   : > { %v1256_v45 = vmax.f32 %v1161_v41, %v1224_v43  ;;  %v1309_v7 = vadd.f32 %v2777_v42, %v1308_v44 }
 0x345   : > { %v1404_v46 = vmul.f32 0.01, %v1309_v7  ;;  %1355 = vmatmul.f32.gmra.mxu1 %v1256_v45 }
 0x346   : > { %v1163_v47 = vpop.f32.mrf.mxu0 }
 0x347   : > { %v1436_v48 = vmax.f32 %v1309_v7, %v1404_v46  ;;  %v1164_v50 = vadd.f32 %v2697_v54, %v1163_v47 }
 0x349   : > { %v1225_v52 = vmul.f32 0.01, %v1164_v50  ;;  %1503 = vmatmul.f32.vlgmr.msrb.gmra.mxu2 %v1436_v48 }
 0x34a   : > { %v1311_v53 = vpop.f32.mrf.mxu1 }
 0x34b   : > { %v1257_v49 = vmax.f32 %v1164_v50, %v1225_v52  ;;  %v1312_v55 = vadd.f32 %v2777_v42, %v1311_v53 }
 0x34d   : > { %v1405_v56 = vmul.f32 0.01, %v1312_v55  ;;  %1358 = vmatmul.f32.gmra.mxu1 %v1257_v49 }
 0x34e   : > { %v1166_v57 = vpop.f32.mrf.mxu0 }
 0x34f   : > { %v1437_v58 = vmax.f32 %v1312_v55, %v1405_v56  ;;  %v1167_v59 = vadd.f32 %v2697_v54, %v1166_v57  ;;  %v2033_v57 = vld [vmem:[%s2959_s2 + $0x310] sm:$0xff] }
 0x350   : > { %1696 = vmatpush.msrb.mxu3 %v2033_v57 }
 0x351   : > { %v1226_v60 = vmul.f32 0.01, %v1167_v59  ;;  %1506 = vmatmul.f32.gmra.mxu2 %v1437_v58 }
 0x352   : > { %v1314_v61 = vpop.f32.mrf.mxu1 }
 0x353   : > { %v1258_v17 = vmax.f32 %v1167_v59, %v1226_v60  ;;  %v1315_v62 = vadd.f32 %v2777_v42, %v1314_v61 }
 0x355   : > { %v1406_v63 = vmul.f32 0.01, %v1315_v62  ;;  %1361 = vmatmul.f32.gmra.mxu1 %v1258_v17 }
 0x356   : > { %v1169_v0 = vpop.f32.mrf.mxu0 }
 0x357   : > { %v1438_v1 = vmax.f32 %v1315_v62, %v1406_v63  ;;  %v1170_v2 = vadd.f32 %v2697_v54, %v1169_v0 }
 0x359   : > { %v1227_v4 = vmul.f32 0.01, %v1170_v2  ;;  %1509 = vmatmul.f32.gmra.mxu2 %v1438_v1 }
 0x35a   : > { %v1317_v5 = vpop.f32.mrf.mxu1 }
 0x35b   : > { %v1259_v6 = vmax.f32 %v1170_v2, %v1227_v4  ;;  %v1318_v8 = vadd.f32 %v2777_v42, %v1317_v5 }
 0x35d   : > { %v1407_v9 = vmul.f32 0.01, %v1318_v8  ;;  %1364 = vmatmul.f32.gmra.mxu1 %v1259_v6 }
 0x35e   : > { %v1172_v10 = vpop.f32.mrf.mxu0 }
 0x35f   : > { %v1439_v11 = vmax.f32 %v1318_v8, %v1407_v9  ;;  %v1173_v12 = vadd.f32 %v2697_v54, %v1172_v10  ;;  %v2032_v10 = vld [vmem:[%s2959_s2 + $0x308] sm:$0xff] }
 0x360   : > { %1697 = vmatpush.msrb.mxu3 %v2032_v10 }
 0x361   : > { %v1228_v13 = vmul.f32 0.01, %v1173_v12  ;;  %1512 = vmatmul.f32.gmra.mxu2 %v1439_v11 }
 0x362   : > { %v1320_v14 = vpop.f32.mrf.mxu1 }
 0x363   : > { %v1260_v15 = vmax.f32 %v1173_v12, %v1228_v13  ;;  %v1321_v16 = vadd.f32 %v2777_v42, %v1320_v14 }
 0x365   : > { %v1408_v18 = vmul.f32 0.01, %v1321_v16  ;;  %1367 = vmatmul.f32.gmra.mxu1 %v1260_v15 }
 0x366   : > { %v1175_v19 = vpop.f32.mrf.mxu0 }
 0x367   : > { %v1440_v20 = vmax.f32 %v1321_v16, %v1408_v18  ;;  %v1176_v21 = vadd.f32 %v2697_v54, %v1175_v19 }
 0x369   : > { %v1229_v23 = vmul.f32 0.01, %v1176_v21  ;;  %1515 = vmatmul.f32.gmra.mxu2 %v1440_v20 }
 0x36a   : > { %v1323_v24 = vpop.f32.mrf.mxu1 }
 0x36b   : > { %v1261_v25 = vmax.f32 %v1176_v21, %v1229_v23  ;;  %v1324_v26 = vadd.f32 %v2777_v42, %v1323_v24 }
 0x36d   : > { %v1409_v27 = vmul.f32 0.01, %v1324_v26  ;;  %1370 = vmatmul.f32.gmra.mxu1 %v1261_v25 }
 0x36e   : > { %v1178_v28 = vpop.f32.mrf.mxu0 }
 0x36f   : > { %v1441_v29 = vmax.f32 %v1324_v26, %v1409_v27  ;;  %v1179_v30 = vadd.f32 %v2697_v54, %v1178_v28  ;;  %v2031_v28 = vld [vmem:[%s2959_s2 + $0x300] sm:$0xff] }
 0x370   : > { %1698 = vmatpush.msrb.mxu3 %v2031_v28 }
 0x371   : > { %v1230_v31 = vmul.f32 0.01, %v1179_v30  ;;  %1518 = vmatmul.f32.gmra.mxu2 %v1441_v29 }
 0x372   : > { %v1326_v32 = vpop.f32.mrf.mxu1 }
 0x373   : > { %v1262_v33 = vmax.f32 %v1179_v30, %v1230_v31  ;;  %v1327_v34 = vadd.f32 %v2777_v42, %v1326_v32 }
 0x375   : > { %v1410_v35 = vmul.f32 0.01, %v1327_v34  ;;  %1373 = vmatmul.f32.gmra.mxu1 %v1262_v33 }
 0x376   : > { %v1181_v36 = vpop.f32.mrf.mxu0 }
 0x377   : > { %v1442_v37 = vmax.f32 %v1327_v34, %v1410_v35  ;;  %v1182_v38 = vadd.f32 %v2697_v54, %v1181_v36 }
 0x379   : > { %v1231_v40 = vmul.f32 0.01, %v1182_v38  ;;  %1521 = vmatmul.f32.gmra.mxu2 %v1442_v37 }
 0x37a   : > { %v1329_v41 = vpop.f32.mrf.mxu1 }
 0x37b   : > { %v1263_v43 = vmax.f32 %v1182_v38, %v1231_v40  ;;  %v1330_v44 = vadd.f32 %v2777_v42, %v1329_v41 }
 0x37d   : > { %v1411_v45 = vmul.f32 0.01, %v1330_v44  ;;  %1376 = vmatmul.f32.gmra.mxu1 %v1263_v43 }
 0x37e   : > { %v1184_v7 = vpop.f32.mrf.mxu0 }
 0x37f   : > { %v1443_v46 = vmax.f32 %v1330_v44, %v1411_v45  ;;  %v1185_v47 = vadd.f32 %v2697_v54, %v1184_v7 }
 0x381   : > { %v1232_v48 = vmul.f32 0.01, %v1185_v47  ;;  %1524 = vmatmul.f32.gmra.mxu2 %v1443_v46 }
 0x382   : > { %v1332_v50 = vpop.f32.mrf.mxu1 }
 0x383   : > { %v1264_v51 = vmax.f32 %v1185_v47, %v1232_v48  ;;  %v1333_v52 = vadd.f32 %v2777_v42, %v1332_v50 }
 0x385   : > { %v1412_v53 = vmul.f32 0.01, %v1333_v52  ;;  %1379 = vmatmul.f32.gmra.mxu1 %v1264_v51 }
 0x386   : > { %v1187_v49 = vpop.f32.mrf.mxu0 }
 0x387   : > { %v1444_v55 = vmax.f32 %v1333_v52, %v1412_v53  ;;  %v1188_v56 = vadd.f32 %v2697_v54, %v1187_v49 }
 0x389   : > { %v1233_v58 = vmul.f32 0.01, %v1188_v56  ;;  %1527 = vmatmul.f32.gmra.mxu2 %v1444_v55 }
 0x38a   : > { %v1335_v59 = vpop.f32.mrf.mxu1 }
 0x38b   : > { %v1265_v60 = vmax.f32 %v1188_v56, %v1233_v58  ;;  %v1336_v61 = vadd.f32 %v2777_v42, %v1335_v59  ;;  %v2832_v56 = vld [vmem:[#allocation4 + $0x6] ss:$0 sm:$0xff] }
 0x38d   : > { %v1413_v17 = vmul.f32 0.01, %v1336_v61  ;;  %1382 = vmatmul.f32.gmra.mxu1 %v1265_v60 }
 0x38e   : > { %v1190_v62 = vpop.f32.mrf.mxu0 }
 0x38f   : > { %v1445_v63 = vmax.f32 %v1336_v61, %v1413_v17  ;;  %v1191_v0 = vadd.f32 %v2697_v54, %v1190_v62 }
 0x391   : > { %v1234_v1 = vmul.f32 0.01, %v1191_v0  ;;  %1530 = vmatmul.f32.gmra.mxu2 %v1445_v63 }
 0x392   : > { %v1338_v2 = vpop.f32.mrf.mxu1 }
 0x393   : > { %v1266_v3 = vmax.f32 %v1191_v0, %v1234_v1  ;;  %v1339_v4 = vadd.f32 %v2777_v42, %v1338_v2 }
 0x395   : > { %v1414_v5 = vmul.f32 0.01, %v1339_v4  ;;  %1385 = vmatmul.f32.gmra.mxu1 %v1266_v3 }
 0x396   : > { %v1193_v6 = vpop.f32.mrf.mxu0 }
 0x397   : > { %v1446_v8 = vmax.f32 %v1339_v4, %v1414_v5  ;;  %v1194_v9 = vadd.f32 %v2697_v54, %v1193_v6 }
 0x399   : > { %v1235_v11 = vmul.f32 0.01, %v1194_v9  ;;  %1533 = vmatmul.f32.gmra.mxu2 %v1446_v8 }
 0x39a   : > { %v1341_v12 = vpop.f32.mrf.mxu1 }
 0x39b   : > { %v1267_v13 = vmax.f32 %v1194_v9, %v1235_v11  ;;  %v1342_v14 = vadd.f32 %v2777_v42, %v1341_v12 }
 0x39d   : > { %v1415_v15 = vmul.f32 0.01, %v1342_v14  ;;  %1388 = vmatmul.f32.gmra.mxu1 %v1267_v13 }
 0x39e   : > { %v1196_v16 = vpop.f32.mrf.mxu0 }
 0x39f   : > { %v1447_v18 = vmax.f32 %v1342_v14, %v1415_v15  ;;  %v1197_v19 = vadd.f32 %v2697_v54, %v1196_v16 }
 0x3a1   : > { %v1236_v20 = vmul.f32 0.01, %v1197_v19  ;;  %1536 = vmatmul.f32.gmra.mxu2 %v1447_v18 }
 0x3a2   : > { %v1344_v21 = vpop.f32.mrf.mxu1 }
 0x3a3   : > { %v1268_v22 = vmax.f32 %v1197_v19, %v1236_v20  ;;  %v1345_v23 = vadd.f32 %v2777_v42, %v1344_v21 }
 0x3a5   : > { %v1416_v24 = vmul.f32 0.01, %v1345_v23  ;;  %1391 = vmatmul.f32.gmra.mxu1 %v1268_v22 }
 0x3a6   : > { %v1199_v25 = vpop.f32.mrf.mxu0 }
 0x3a7   : > { %v1448_v26 = vmax.f32 %v1345_v23, %v1416_v24  ;;  %v1200_v27 = vadd.f32 %v2697_v54, %v1199_v25 }
 0x3a9   : > { %v1237_v29 = vmul.f32 0.01, %v1200_v27  ;;  %1539 = vmatmul.f32.gmra.mxu2 %v1448_v26 }
 0x3aa   : > { %v1347_v30 = vpop.f32.mrf.mxu1 }
 0x3ab   : > { %v1269_v31 = vmax.f32 %v1200_v27, %v1237_v29  ;;  %v1348_v32 = vadd.f32 %v2777_v42, %v1347_v30 }
 0x3ad   : > { %v1417_v33 = vmul.f32 0.01, %v1348_v32  ;;  %1394 = vmatmul.f32.gmra.mxu1 %v1269_v31 }
 0x3ae   : > { %v1202_v34 = vpop.f32.mrf.mxu0 }
 0x3af   : > { %v1449_v35 = vmax.f32 %v1348_v32, %v1417_v33  ;;  %v1203_v36 = vadd.f32 %v2697_v54, %v1202_v34 }
 0x3b1   : > { %v1238_v37 = vmul.f32 0.01, %v1203_v36  ;;  %1542 = vmatmul.f32.gmra.mxu2 %v1449_v35 }
 0x3b2   : > { %v1350_v38 = vpop.f32.mrf.mxu1 }
 0x3b3   : > { %v1270_v39 = vmax.f32 %v1203_v36, %v1238_v37  ;;  %v1351_v40 = vadd.f32 %v2777_v42, %v1350_v38 }
 0x3b5   : > { %v1418_v41 = vmul.f32 0.01, %v1351_v40  ;;  %1397 = vmatmul.f32.gmra.mxu1 %v1270_v39 }
 0x3b6   : > { %v1205_v43 = vpop.f32.mrf.mxu0 }
 0x3b7   : > { %v1450_v44 = vmax.f32 %v1351_v40, %v1418_v41  ;;  %v1206_v45 = vadd.f32 %v2697_v54, %v1205_v43 }
 0x3b9   : > { %v1239_v7 = vmul.f32 0.01, %v1206_v45  ;;  %1545 = vmatmul.f32.gmra.mxu2 %v1450_v44 }
 0x3ba   : > { %v1353_v46 = vpop.f32.mrf.mxu1 }
 0x3bb   : > { %v1271_v47 = vmax.f32 %v1206_v45, %v1239_v7  ;;  %v1354_v48 = vadd.f32 %v2777_v42, %v1353_v46 }
 0x3bd   : > { %v1419_v50 = vmul.f32 0.01, %v1354_v48  ;;  %1400 = vmatmul.f32.gmra.mxu1 %v1271_v47 }
 0x3bf   : > { %v1451_v51 = vmax.f32 %v1354_v48, %v1419_v50 }
 0x3c1   : > { %1548 = vmatmul.f32.gmra.mxu2 %v1451_v51 }
 0x3c2   : > { %v1356_v52 = vpop.f32.mrf.mxu1 }
 0x3c3   : > { %v1357_v53 = vadd.f32 %v2777_v42, %v1356_v52 }
 0x3c5   : > { %v1420_v49 = vmul.f32 0.01, %v1357_v53 }
 0x3c7   : > { %v1452_v55 = vmax.f32 %v1357_v53, %v1420_v49 }
 0x3c9   : > { %1551 = vmatmul.f32.gmra.mxu2 %v1452_v55 }
 0x3ca   : > { %v1359_v57 = vpop.f32.mrf.mxu1 }
 0x3cb   : > { %v1360_v54 = vadd.f32 %v2777_v42, %v1359_v57 }
 0x3cc   : > { %v1504_v58 = vpop.f32.mrf.mxu2 }
 0x3cd   : > { %v1421_v59 = vmul.f32 0.01, %v1360_v54  ;;  %v1505_v60 = vadd.f32 %v2832_v56, %v1504_v58 }
 0x3cf   : > { %v1453_v61 = vmax.f32 %v1360_v54, %v1421_v59  ;;  %v1600_v17 = vmul.f32 0.01, %v1505_v60 }
 0x3d1   : > { %v1632_v62 = vmax.f32 %v1505_v60, %v1600_v17  ;;  %1554 = vmatmul.f32.gmra.mxu2 %v1453_v61 }
 0x3d2   : > { %v1362_v63 = vpop.f32.mrf.mxu1 }
 0x3d3   : > { %v1363_v0 = vadd.f32 %v2777_v42, %v1362_v63  ;;  %1699 = vmatmul.f32.vlgmr.msrb.gmra.mxu3 %v1632_v62 }
 0x3d4   : > { %v1507_v1 = vpop.f32.mrf.mxu2 }
 0x3d5   : > { %v1422_v2 = vmul.f32 0.01, %v1363_v0  ;;  %v1508_v3 = vadd.f32 %v2832_v56, %v1507_v1 }
 0x3d7   : > { %v1454_v4 = vmax.f32 %v1363_v0, %v1422_v2  ;;  %v1601_v5 = vmul.f32 0.01, %v1508_v3 }
 0x3d9   : > { %v1633_v6 = vmax.f32 %v1508_v3, %v1601_v5  ;;  %1557 = vmatmul.f32.gmra.mxu2 %v1454_v4 }
 0x3da   : > { %v1365_v8 = vpop.f32.mrf.mxu1 }
 0x3db   : > { %v1366_v9 = vadd.f32 %v2777_v42, %v1365_v8  ;;  %1702 = vmatmul.f32.gmra.mxu3 %v1633_v6 }
 0x3dc   : > { %v1510_v10 = vpop.f32.mrf.mxu2 }
 0x3dd   : > { %v1423_v11 = vmul.f32 0.01, %v1366_v9  ;;  %v1511_v12 = vadd.f32 %v2832_v56, %v1510_v10 }
 0x3df   : > { %v1455_v13 = vmax.f32 %v1366_v9, %v1423_v11  ;;  %v1602_v14 = vmul.f32 0.01, %v1511_v12 }
 0x3e1   : > { %v1634_v15 = vmax.f32 %v1511_v12, %v1602_v14  ;;  %1560 = vmatmul.f32.gmra.mxu2 %v1455_v13 }
 0x3e2   : > { %v1368_v16 = vpop.f32.mrf.mxu1 }
 0x3e3   : > { %v1369_v18 = vadd.f32 %v2777_v42, %v1368_v16  ;;  %1705 = vmatmul.f32.gmra.mxu3 %v1634_v15 }
 0x3e4   : > { %v1513_v19 = vpop.f32.mrf.mxu2 }
 0x3e5   : > { %v1424_v20 = vmul.f32 0.01, %v1369_v18  ;;  %v1514_v21 = vadd.f32 %v2832_v56, %v1513_v19 }
 0x3e7   : > { %v1456_v22 = vmax.f32 %v1369_v18, %v1424_v20  ;;  %v1603_v23 = vmul.f32 0.01, %v1514_v21 }
 0x3e9   : > { %v1635_v24 = vmax.f32 %v1514_v21, %v1603_v23  ;;  %1563 = vmatmul.f32.gmra.mxu2 %v1456_v22 }
 0x3ea   : > { %v1371_v25 = vpop.f32.mrf.mxu1 }
 0x3eb   : > { %v1372_v26 = vadd.f32 %v2777_v42, %v1371_v25  ;;  %1708 = vmatmul.f32.gmra.mxu3 %v1635_v24 }
 0x3ec   : > { %v1516_v27 = vpop.f32.mrf.mxu2 }
 0x3ed   : > { %v1425_v28 = vmul.f32 0.01, %v1372_v26  ;;  %v1517_v29 = vadd.f32 %v2832_v56, %v1516_v27 }
 0x3ef   : > { %v1457_v30 = vmax.f32 %v1372_v26, %v1425_v28  ;;  %v1604_v31 = vmul.f32 0.01, %v1517_v29 }
 0x3f1   : > { %v1636_v32 = vmax.f32 %v1517_v29, %v1604_v31  ;;  %1566 = vmatmul.f32.gmra.mxu2 %v1457_v30 }
 0x3f2   : > { %v1374_v33 = vpop.f32.mrf.mxu1 }
 0x3f3   : > { %v1375_v34 = vadd.f32 %v2777_v42, %v1374_v33  ;;  %1711 = vmatmul.f32.gmra.mxu3 %v1636_v32 }
 0x3f4   : > { %v1519_v35 = vpop.f32.mrf.mxu2 }
 0x3f5   : > { %v1426_v36 = vmul.f32 0.01, %v1375_v34  ;;  %v1520_v37 = vadd.f32 %v2832_v56, %v1519_v35 }
 0x3f7   : > { %v1458_v38 = vmax.f32 %v1375_v34, %v1426_v36  ;;  %v1605_v39 = vmul.f32 0.01, %v1520_v37 }
 0x3f9   : > { %v1637_v40 = vmax.f32 %v1520_v37, %v1605_v39  ;;  %1569 = vmatmul.f32.gmra.mxu2 %v1458_v38 }
 0x3fa   : > { %v1377_v41 = vpop.f32.mrf.mxu1 }
 0x3fb   : > { %v1378_v43 = vadd.f32 %v2777_v42, %v1377_v41  ;;  %1714 = vmatmul.f32.gmra.mxu3 %v1637_v40 }
 0x3fc   : > { %v1522_v44 = vpop.f32.mrf.mxu2 }
 0x3fd   : > { %v1427_v45 = vmul.f32 0.01, %v1378_v43  ;;  %v1523_v7 = vadd.f32 %v2832_v56, %v1522_v44 }
 0x3ff   : > { %v1459_v46 = vmax.f32 %v1378_v43, %v1427_v45  ;;  %v1606_v47 = vmul.f32 0.01, %v1523_v7 }
 0x401   : > { %v1638_v48 = vmax.f32 %v1523_v7, %v1606_v47  ;;  %1572 = vmatmul.f32.gmra.mxu2 %v1459_v46 }
 0x402   : > { %v1380_v50 = vpop.f32.mrf.mxu1 }
 0x403   : > { %v1381_v51 = vadd.f32 %v2777_v42, %v1380_v50  ;;  %1717 = vmatmul.f32.gmra.mxu3 %v1638_v48 }
 0x404   : > { %v1525_v52 = vpop.f32.mrf.mxu2 }
 0x405   : > { %v1428_v53 = vmul.f32 0.01, %v1381_v51  ;;  %v1526_v49 = vadd.f32 %v2832_v56, %v1525_v52 }
 0x407   : > { %v1460_v55 = vmax.f32 %v1381_v51, %v1428_v53  ;;  %v1607_v57 = vmul.f32 0.01, %v1526_v49 }
 0x409   : > { %v1639_v54 = vmax.f32 %v1526_v49, %v1607_v57  ;;  %1575 = vmatmul.f32.gmra.mxu2 %v1460_v55 }
 0x40a   : > { %v1383_v58 = vpop.f32.mrf.mxu1 }
 0x40b   : > { %v1384_v59 = vadd.f32 %v2777_v42, %v1383_v58  ;;  %1720 = vmatmul.f32.gmra.mxu3 %v1639_v54 }
 0x40c   : > { %v1528_v60 = vpop.f32.mrf.mxu2 }
 0x40d   : > { %v1429_v61 = vmul.f32 0.01, %v1384_v59  ;;  %v1529_v17 = vadd.f32 %v2832_v56, %v1528_v60 }
 0x40f   : > { %v1461_v62 = vmax.f32 %v1384_v59, %v1429_v61  ;;  %v1608_v63 = vmul.f32 0.01, %v1529_v17  ;;  %v2866_v59 = vld [vmem:[#allocation4 + $0x7] ss:$0 sm:$0xff] }
 0x411   : > { %v1640_v0 = vmax.f32 %v1529_v17, %v1608_v63  ;;  %1578 = vmatmul.f32.gmra.mxu2 %v1461_v62 }
 0x412   : > { %v1386_v1 = vpop.f32.mrf.mxu1 }
 0x413   : > { %v1387_v2 = vadd.f32 %v2777_v42, %v1386_v1  ;;  %1723 = vmatmul.f32.gmra.mxu3 %v1640_v0 }
 0x414   : > { %v1531_v3 = vpop.f32.mrf.mxu2 }
 0x415   : > { %v1430_v4 = vmul.f32 0.01, %v1387_v2  ;;  %v1532_v5 = vadd.f32 %v2832_v56, %v1531_v3 }
 0x417   : > { %v1462_v6 = vmax.f32 %v1387_v2, %v1430_v4  ;;  %v1609_v8 = vmul.f32 0.01, %v1532_v5 }
 0x419   : > { %v1641_v9 = vmax.f32 %v1532_v5, %v1609_v8  ;;  %1581 = vmatmul.f32.gmra.mxu2 %v1462_v6 }
 0x41a   : > { %v1389_v10 = vpop.f32.mrf.mxu1 }
 0x41b   : > { %v1390_v11 = vadd.f32 %v2777_v42, %v1389_v10  ;;  %1726 = vmatmul.f32.gmra.mxu3 %v1641_v9 }
 0x41c   : > { %v1534_v12 = vpop.f32.mrf.mxu2 }
 0x41d   : > { %v1431_v13 = vmul.f32 0.01, %v1390_v11  ;;  %v1535_v14 = vadd.f32 %v2832_v56, %v1534_v12 }
 0x41f   : > { %v1463_v15 = vmax.f32 %v1390_v11, %v1431_v13  ;;  %v1610_v16 = vmul.f32 0.01, %v1535_v14 }
 0x421   : > { %v1642_v18 = vmax.f32 %v1535_v14, %v1610_v16  ;;  %1584 = vmatmul.f32.gmra.mxu2 %v1463_v15 }
 0x422   : > { %v1392_v19 = vpop.f32.mrf.mxu1 }
 0x423   : > { %v1393_v20 = vadd.f32 %v2777_v42, %v1392_v19  ;;  %1729 = vmatmul.f32.gmra.mxu3 %v1642_v18 }
 0x424   : > { %v1537_v21 = vpop.f32.mrf.mxu2 }
 0x425   : > { %v1432_v22 = vmul.f32 0.01, %v1393_v20  ;;  %v1538_v23 = vadd.f32 %v2832_v56, %v1537_v21 }
 0x427   : > { %v1464_v24 = vmax.f32 %v1393_v20, %v1432_v22  ;;  %v1611_v25 = vmul.f32 0.01, %v1538_v23 }
 0x429   : > { %v1643_v26 = vmax.f32 %v1538_v23, %v1611_v25  ;;  %1587 = vmatmul.f32.gmra.mxu2 %v1464_v24 }
 0x42a   : > { %v1395_v27 = vpop.f32.mrf.mxu1 }
 0x42b   : > { %v1396_v28 = vadd.f32 %v2777_v42, %v1395_v27  ;;  %1732 = vmatmul.f32.gmra.mxu3 %v1643_v26 }
 0x42c   : > { %v1540_v29 = vpop.f32.mrf.mxu2 }
 0x42d   : > { %v1433_v30 = vmul.f32 0.01, %v1396_v28  ;;  %v1541_v31 = vadd.f32 %v2832_v56, %v1540_v29 }
 0x42f   : > { %v1465_v32 = vmax.f32 %v1396_v28, %v1433_v30  ;;  %v1612_v33 = vmul.f32 0.01, %v1541_v31 }
 0x431   : > { %v1644_v34 = vmax.f32 %v1541_v31, %v1612_v33  ;;  %1590 = vmatmul.f32.gmra.mxu2 %v1465_v32 }
 0x432   : > { %v1398_v35 = vpop.f32.mrf.mxu1 }
 0x433   : > { %v1399_v36 = vadd.f32 %v2777_v42, %v1398_v35  ;;  %1735 = vmatmul.f32.gmra.mxu3 %v1644_v34 }
 0x434   : > { %v1543_v37 = vpop.f32.mrf.mxu2 }
 0x435   : > { %v1434_v38 = vmul.f32 0.01, %v1399_v36  ;;  %v1544_v39 = vadd.f32 %v2832_v56, %v1543_v37 }
 0x437   : > { %v1466_v40 = vmax.f32 %v1399_v36, %v1434_v38  ;;  %v1613_v41 = vmul.f32 0.01, %v1544_v39 }
 0x439   : > { %v1645_v43 = vmax.f32 %v1544_v39, %v1613_v41  ;;  %1593 = vmatmul.f32.gmra.mxu2 %v1466_v40 }
 0x43a   : > { %v1401_v44 = vpop.f32.mrf.mxu1 }
 0x43b   : > { %v1402_v45 = vadd.f32 %v2777_v42, %v1401_v44  ;;  %1738 = vmatmul.f32.gmra.mxu3 %v1645_v43 }
 0x43c   : > { %v1546_v7 = vpop.f32.mrf.mxu2 }
 0x43d   : > { %v1435_v46 = vmul.f32 0.01, %v1402_v45  ;;  %v1547_v47 = vadd.f32 %v2832_v56, %v1546_v7 }
 0x43f   : > { %v1467_v48 = vmax.f32 %v1402_v45, %v1435_v46  ;;  %v1614_v50 = vmul.f32 0.01, %v1547_v47 }
 0x441   : > { %v1646_v51 = vmax.f32 %v1547_v47, %v1614_v50  ;;  %1596 = vmatmul.f32.gmra.mxu2 %v1467_v48 }
 0x443   : > { %1741 = vmatmul.f32.gmra.mxu3 %v1646_v51 }
 0x444   : > { %v1549_v52 = vpop.f32.mrf.mxu2 }
 0x445   : > { %v1550_v53 = vadd.f32 %v2832_v56, %v1549_v52 }
 0x447   : > { %v1615_v49 = vmul.f32 0.01, %v1550_v53 }
 0x449   : > { %v1647_v55 = vmax.f32 %v1550_v53, %v1615_v49 }
 0x44b   : > { %1744 = vmatmul.f32.gmra.mxu3 %v1647_v55 }
 0x44c   : > { %v1552_v57 = vpop.f32.mrf.mxu2 }
 0x44d   : > { %v1553_v42 = vadd.f32 %v2832_v56, %v1552_v57 }
 0x44f   : > { %v1616_v54 = vmul.f32 0.01, %v1553_v42 }
 0x451   : > { %v1648_v58 = vmax.f32 %v1553_v42, %v1616_v54 }
 0x453   : > { %1747 = vmatmul.f32.gmra.mxu3 %v1648_v58 }
 0x454   : > { %v1555_v60 = vpop.f32.mrf.mxu2 }
 0x455   : > { %v1556_v61 = vadd.f32 %v2832_v56, %v1555_v60 }
 0x456   : > { %v1700_v17 = vpop.f32.mrf.mxu3 }
 0x457   : > { %v1617_v62 = vmul.f32 0.01, %v1556_v61  ;;  %v1701_v63 = vadd.f32 %v2866_v59, %v1700_v17 }
 0x459   : > { %v1649_v0 = vmax.f32 %v1556_v61, %v1617_v62  ;;  %1796 = vst [vmem:[%s2874_s8] sm:$0xff] %v1701_v63 }
 0x45b   : > { %1750 = vmatmul.f32.gmra.mxu3 %v1649_v0 }
 0x45c   : > { %v1558_v1 = vpop.f32.mrf.mxu2 }
 0x45d   : > { %v1559_v2 = vadd.f32 %v2832_v56, %v1558_v1 }
 0x45e   : > { %v1703_v3 = vpop.f32.mrf.mxu3 }
 0x45f   : > { %v1618_v4 = vmul.f32 0.01, %v1559_v2  ;;  %v1704_v5 = vadd.f32 %v2866_v59, %v1703_v3 }
 0x461   : > { %v1650_v6 = vmax.f32 %v1559_v2, %v1618_v4  ;;  %1797 = vst [vmem:[%s2874_s8 + $0x8] sm:$0xff] %v1704_v5 }
 0x463   : > { %1753 = vmatmul.f32.gmra.mxu3 %v1650_v6 }
 0x464   : > { %v1561_v8 = vpop.f32.mrf.mxu2 }
 0x465   : > { %v1562_v9 = vadd.f32 %v2832_v56, %v1561_v8 }
 0x466   : > { %v1706_v10 = vpop.f32.mrf.mxu3 }
 0x467   : > { %v1619_v11 = vmul.f32 0.01, %v1562_v9  ;;  %v1707_v12 = vadd.f32 %v2866_v59, %v1706_v10 }
 0x469   : > { %v1651_v13 = vmax.f32 %v1562_v9, %v1619_v11  ;;  %1798 = vst [vmem:[%s2874_s8 + $0x10] sm:$0xff] %v1707_v12 }
 0x46b   : > { %1756 = vmatmul.f32.gmra.mxu3 %v1651_v13 }
 0x46c   : > { %v1564_v14 = vpop.f32.mrf.mxu2 }
 0x46d   : > { %v1565_v15 = vadd.f32 %v2832_v56, %v1564_v14 }
 0x46e   : > { %v1709_v16 = vpop.f32.mrf.mxu3 }
 0x46f   : > { %v1620_v18 = vmul.f32 0.01, %v1565_v15  ;;  %v1710_v19 = vadd.f32 %v2866_v59, %v1709_v16 }
 0x471   : > { %v1652_v20 = vmax.f32 %v1565_v15, %v1620_v18  ;;  %1799 = vst [vmem:[%s2874_s8 + $0x18] sm:$0xff] %v1710_v19 }
 0x473   : > { %1759 = vmatmul.f32.gmra.mxu3 %v1652_v20 }
 0x474   : > { %v1567_v21 = vpop.f32.mrf.mxu2 }
 0x475   : > { %v1568_v22 = vadd.f32 %v2832_v56, %v1567_v21 }
 0x476   : > { %v1712_v23 = vpop.f32.mrf.mxu3 }
 0x477   : > { %v1621_v24 = vmul.f32 0.01, %v1568_v22  ;;  %v1713_v25 = vadd.f32 %v2866_v59, %v1712_v23 }
 0x479   : > { %v1653_v26 = vmax.f32 %v1568_v22, %v1621_v24  ;;  %1800 = vst [vmem:[%s2874_s8 + $0x20] sm:$0xff] %v1713_v25 }
 0x47b   : > { %1762 = vmatmul.f32.gmra.mxu3 %v1653_v26 }
 0x47c   : > { %v1570_v27 = vpop.f32.mrf.mxu2 }
 0x47d   : > { %v1571_v28 = vadd.f32 %v2832_v56, %v1570_v27 }
 0x47e   : > { %v1715_v29 = vpop.f32.mrf.mxu3 }
 0x47f   : > { %v1622_v30 = vmul.f32 0.01, %v1571_v28  ;;  %v1716_v31 = vadd.f32 %v2866_v59, %v1715_v29 }
 0x481   : > { %v1654_v32 = vmax.f32 %v1571_v28, %v1622_v30  ;;  %1801 = vst [vmem:[%s2874_s8 + $0x28] sm:$0xff] %v1716_v31 }
 0x483   : > { %1765 = vmatmul.f32.gmra.mxu3 %v1654_v32 }
 0x484   : > { %v1573_v33 = vpop.f32.mrf.mxu2 }
 0x485   : > { %v1574_v34 = vadd.f32 %v2832_v56, %v1573_v33 }
 0x486   : > { %v1718_v35 = vpop.f32.mrf.mxu3 }
 0x487   : > { %v1623_v36 = vmul.f32 0.01, %v1574_v34  ;;  %v1719_v37 = vadd.f32 %v2866_v59, %v1718_v35 }
 0x489   : > { %v1655_v38 = vmax.f32 %v1574_v34, %v1623_v36  ;;  %1802 = vst [vmem:[%s2874_s8 + $0x30] sm:$0xff] %v1719_v37 }
 0x48b   : > { %1768 = vmatmul.f32.gmra.mxu3 %v1655_v38 }
 0x48c   : > { %v1576_v39 = vpop.f32.mrf.mxu2 }
 0x48d   : > { %v1577_v40 = vadd.f32 %v2832_v56, %v1576_v39 }
 0x48e   : > { %v1721_v41 = vpop.f32.mrf.mxu3 }
 0x48f   : > { %v1624_v43 = vmul.f32 0.01, %v1577_v40  ;;  %v1722_v44 = vadd.f32 %v2866_v59, %v1721_v41 }
 0x491   : > { %v1656_v45 = vmax.f32 %v1577_v40, %v1624_v43  ;;  %1803 = vst [vmem:[%s2874_s8 + $0x38] sm:$0xff] %v1722_v44 }
 0x493   : > { %1771 = vmatmul.f32.gmra.mxu3 %v1656_v45 }
 0x494   : > { %v1579_v7 = vpop.f32.mrf.mxu2 }
 0x495   : > { %v1580_v46 = vadd.f32 %v2832_v56, %v1579_v7 }
 0x496   : > { %v1724_v47 = vpop.f32.mrf.mxu3 }
 0x497   : > { %v1625_v48 = vmul.f32 0.01, %v1580_v46  ;;  %v1725_v50 = vadd.f32 %v2866_v59, %v1724_v47 }
 0x499   : > { %v1657_v51 = vmax.f32 %v1580_v46, %v1625_v48  ;;  %1804 = vst [vmem:[%s2874_s8 + $0x40] sm:$0xff] %v1725_v50 }
 0x49b   : > { %1774 = vmatmul.f32.gmra.mxu3 %v1657_v51 }
 0x49c   : > { %v1582_v52 = vpop.f32.mrf.mxu2 }
 0x49d   : > { %v1583_v53 = vadd.f32 %v2832_v56, %v1582_v52 }
 0x49e   : > { %v1727_v49 = vpop.f32.mrf.mxu3 }
 0x49f   : > { %v1626_v55 = vmul.f32 0.01, %v1583_v53  ;;  %v1728_v57 = vadd.f32 %v2866_v59, %v1727_v49 }
 0x4a1   : > { %v1658_v42 = vmax.f32 %v1583_v53, %v1626_v55  ;;  %1805 = vst [vmem:[%s2874_s8 + $0x48] sm:$0xff] %v1728_v57 }
 0x4a3   : > { %1777 = vmatmul.f32.gmra.mxu3 %v1658_v42 }
 0x4a4   : > { %v1585_v54 = vpop.f32.mrf.mxu2 }
 0x4a5   : > { %v1586_v58 = vadd.f32 %v2832_v56, %v1585_v54 }
 0x4a6   : > { %v1730_v60 = vpop.f32.mrf.mxu3 }
 0x4a7   : > { %v1627_v61 = vmul.f32 0.01, %v1586_v58  ;;  %v1731_v17 = vadd.f32 %v2866_v59, %v1730_v60 }
 0x4a9   : > { %v1659_v62 = vmax.f32 %v1586_v58, %v1627_v61  ;;  %1806 = vst [vmem:[%s2874_s8 + $0x50] sm:$0xff] %v1731_v17 }
 0x4ab   : > { %1780 = vmatmul.f32.gmra.mxu3 %v1659_v62 }
 0x4ac   : > { %v1588_v63 = vpop.f32.mrf.mxu2 }
 0x4ad   : > { %v1589_v0 = vadd.f32 %v2832_v56, %v1588_v63 }
 0x4ae   : > { %v1733_v1 = vpop.f32.mrf.mxu3 }
 0x4af   : > { %v1628_v2 = vmul.f32 0.01, %v1589_v0  ;;  %v1734_v3 = vadd.f32 %v2866_v59, %v1733_v1 }
 0x4b1   : > { %v1660_v4 = vmax.f32 %v1589_v0, %v1628_v2  ;;  %1807 = vst [vmem:[%s2874_s8 + $0x58] sm:$0xff] %v1734_v3 }
 0x4b3   : > { %1783 = vmatmul.f32.gmra.mxu3 %v1660_v4 }
 0x4b4   : > { %v1591_v5 = vpop.f32.mrf.mxu2 }
 0x4b5   : > { %v1592_v6 = vadd.f32 %v2832_v56, %v1591_v5 }
 0x4b6   : > { %v1736_v8 = vpop.f32.mrf.mxu3 }
 0x4b7   : > { %v1629_v9 = vmul.f32 0.01, %v1592_v6  ;;  %v1737_v10 = vadd.f32 %v2866_v59, %v1736_v8 }
 0x4b9   : > { %v1661_v11 = vmax.f32 %v1592_v6, %v1629_v9  ;;  %1808 = vst [vmem:[%s2874_s8 + $0x60] sm:$0xff] %v1737_v10 }
 0x4bb   : > { %1786 = vmatmul.f32.gmra.mxu3 %v1661_v11 }
 0x4bc   : > { %v1594_v12 = vpop.f32.mrf.mxu2 }
 0x4bd   : > { %v1595_v13 = vadd.f32 %v2832_v56, %v1594_v12 }
 0x4be   : > { %v1739_v14 = vpop.f32.mrf.mxu3 }
 0x4bf   : > { %v1630_v15 = vmul.f32 0.01, %v1595_v13  ;;  %v1740_v16 = vadd.f32 %v2866_v59, %v1739_v14 }
 0x4c1   : > { %v1662_v18 = vmax.f32 %v1595_v13, %v1630_v15  ;;  %1809 = vst [vmem:[%s2874_s8 + $0x68] sm:$0xff] %v1740_v16 }
 0x4c3   : > { %1789 = vmatmul.f32.gmra.mxu3 %v1662_v18 }
 0x4c4   : > { %v1597_v19 = vpop.f32.mrf.mxu2 }
 0x4c5   : > { %v1598_v20 = vadd.f32 %v2832_v56, %v1597_v19 }
 0x4c6   : > { %v1742_v21 = vpop.f32.mrf.mxu3 }
 0x4c7   : > { %v1631_v22 = vmul.f32 0.01, %v1598_v20  ;;  %v1743_v23 = vadd.f32 %v2866_v59, %v1742_v21 }
 0x4c9   : > { %v1663_v24 = vmax.f32 %v1598_v20, %v1631_v22  ;;  %1810 = vst [vmem:[%s2874_s8 + $0x70] sm:$0xff] %v1743_v23 }
 0x4cb   : > { %1792 = vmatmul.f32.gmra.mxu3 %v1663_v24 }
 0x4ce   : > { %v1745_v25 = vpop.f32.mrf.mxu3 }
 0x4cf   : > { %v1746_v26 = vadd.f32 %v2866_v59, %v1745_v25 }
 0x4d1   : > { %1811 = vst [vmem:[%s2874_s8 + $0x78] sm:$0xff] %v1746_v26 }
 0x4d6   : > { %v1748_v27 = vpop.f32.mrf.mxu3 }
 0x4d7   : > { %v1749_v28 = vadd.f32 %v2866_v59, %v1748_v27 }
 0x4d9   : > { %1812 = vst [vmem:[%s2874_s8 + $0x80] sm:$0xff] %v1749_v28 }
 0x4de   : > { %v1751_v56 = vpop.f32.mrf.mxu3 }
 0x4df   : > { %v1752_v29 = vadd.f32 %v2866_v59, %v1751_v56 }
 0x4e1   : > { %1813 = vst [vmem:[%s2874_s8 + $0x88] sm:$0xff] %v1752_v29 }
 0x4e6   : > { %v1754_v30 = vpop.f32.mrf.mxu3 }
 0x4e7   : > { %v1755_v31 = vadd.f32 %v2866_v59, %v1754_v30 }
 0x4e9   : > { %1814 = vst [vmem:[%s2874_s8 + $0x90] sm:$0xff] %v1755_v31 }
 0x4ee   : > { %v1757_v32 = vpop.f32.mrf.mxu3 }
 0x4ef   : > { %v1758_v33 = vadd.f32 %v2866_v59, %v1757_v32 }
 0x4f1   : > { %1815 = vst [vmem:[%s2874_s8 + $0x98] sm:$0xff] %v1758_v33 }
 0x4f6   : > { %v1760_v34 = vpop.f32.mrf.mxu3 }
 0x4f7   : > { %v1761_v35 = vadd.f32 %v2866_v59, %v1760_v34 }
 0x4f9   : > { %1816 = vst [vmem:[%s2874_s8 + $0xa0] sm:$0xff] %v1761_v35 }
 0x4fe   : > { %v1763_v36 = vpop.f32.mrf.mxu3 }
 0x4ff   : > { %v1764_v37 = vadd.f32 %v2866_v59, %v1763_v36 }
 0x501   : > { %1817 = vst [vmem:[%s2874_s8 + $0xa8] sm:$0xff] %v1764_v37 }
 0x506   : > { %v1766_v38 = vpop.f32.mrf.mxu3 }
 0x507   : > { %v1767_v39 = vadd.f32 %v2866_v59, %v1766_v38 }
 0x509   : > { %1818 = vst [vmem:[%s2874_s8 + $0xb0] sm:$0xff] %v1767_v39 }
 0x50e   : > { %v1769_v40 = vpop.f32.mrf.mxu3 }
 0x50f   : > { %v1770_v41 = vadd.f32 %v2866_v59, %v1769_v40 }
 0x511   : > { %1819 = vst [vmem:[%s2874_s8 + $0xb8] sm:$0xff] %v1770_v41 }
 0x516   : > { %v1772_v43 = vpop.f32.mrf.mxu3 }
 0x517   : > { %v1773_v44 = vadd.f32 %v2866_v59, %v1772_v43 }
 0x519   : > { %1820 = vst [vmem:[%s2874_s8 + $0xc0] sm:$0xff] %v1773_v44 }
 0x51e   : > { %v1775_v45 = vpop.f32.mrf.mxu3 }
 0x51f   : > { %v1776_v7 = vadd.f32 %v2866_v59, %v1775_v45 }
 0x521   : > { %1821 = vst [vmem:[%s2874_s8 + $0xc8] sm:$0xff] %v1776_v7 }
 0x526   : > { %v1778_v46 = vpop.f32.mrf.mxu3 }
 0x527   : > { %v1779_v47 = vadd.f32 %v2866_v59, %v1778_v46 }
 0x529   : > { %1822 = vst [vmem:[%s2874_s8 + $0xd0] sm:$0xff] %v1779_v47 }
 0x52e   : > { %v1781_v48 = vpop.f32.mrf.mxu3 }
 0x52f   : > { %v1782_v50 = vadd.f32 %v2866_v59, %v1781_v48 }
 0x531   : > { %1823 = vst [vmem:[%s2874_s8 + $0xd8] sm:$0xff] %v1782_v50 }
 0x536   : > { %v1784_v51 = vpop.f32.mrf.mxu3 }
 0x537   : > { %v1785_v52 = vadd.f32 %v2866_v59, %v1784_v51 }
 0x539   : > { %1824 = vst [vmem:[%s2874_s8 + $0xe0] sm:$0xff] %v1785_v52 }
 0x53e   : > { %v1787_v53 = vpop.f32.mrf.mxu3 }
 0x53f   : > { %v1788_v49 = vadd.f32 %v2866_v59, %v1787_v53 }
 0x541   : > { %1825 = vst [vmem:[%s2874_s8 + $0xe8] sm:$0xff] %v1788_v49 }
 0x546   : > { %v1790_v55 = vpop.f32.mrf.mxu3 }
 0x547   : > { %v1791_v57 = vadd.f32 %v2866_v59, %v1790_v55 }
 0x549   : > { %1826 = vst [vmem:[%s2874_s8 + $0xf0] sm:$0xff] %v1791_v57 }
 0x54e   : > { %v1793_v42 = vpop.f32.mrf.mxu3 }
 0x54f   : > { %v1794_v54 = vadd.f32 %v2866_v59, %v1793_v42 }
 0x551   : > { %1827 = vst [vmem:[%s2874_s8 + $0xf8] sm:$0xff] %v1794_v54 }
 0x552 PF: > { %s16_s15 = sadd.s32 1, %s2162_s15  }
 0x553   : > { %p13_p7 = scmp.ge.s32.totalorder %s16_s15, 4  }
 0x555   :  { %15 = sbr.rel (!%p13_p7) target bundleno = 2 (0x2), region = 81 }
 0x55a   :  { %1850 = vsyncpa [#allocation3], 1 }
 0x55b   :  { %1852 = vsyncpa [#allocation3 + $0x1], 1 }
 0x55c   :  { %1853 = vsyncpa [#allocation5], 1 }

</bundles_post_ra>
